<compile_context>
chip_gen: v7x
topology: tpu7x:2x2x1
jax: 0.10.0
libtpu: 0.0.40
codegen_flags: <defaults>
</compile_context>

<pallas_src>
import jax
import jax.numpy as jnp
from jax.experimental import pallas as pl
from jax.experimental.pallas import tpu as pltpu


def _attention_kernel(g_ref, x_ref, wgT_ref, wxT_ref, b_ref, wpsiT_ref, bpsi_ref,
                      o_ref):
    # Block shapes:
    #   g_ref : (1, F_g, tile_s)      x_ref : (1, F_l, tile_s)
    #   wgT   : (F_int, F_g)          wxT   : (F_int, F_l)
    #   b     : (F_int, 1)  (bg + bx combined)
    #   wpsiT : (1, F_int)            bpsi  : (1, 1)
    #   o_ref : (1, F_l, tile_s)
    g = g_ref[0].astype(jnp.float32)          # (F_g, tile_s)  compute stays f32
    x = x_ref[0].astype(jnp.float32)          # (F_l, tile_s)

    # pre[j, s] = (W_g g)[j,s] + (W_x x)[j,s] + b[j]  -- two small dots on the
    # otherwise idle MXU (spatial axis on lanes), instead of 8 unrolled
    # read-modify-write VPU passes over the (F_int, tile_s) accumulator.
    acc = (jnp.dot(wgT_ref[...], g, preferred_element_type=jnp.float32)
           + jnp.dot(wxT_ref[...], x, preferred_element_type=jnp.float32)
           + b_ref[...])                      # (F_int, tile_s)
    p = jnp.maximum(acc, 0.0)                 # ReLU

    # psi = sigmoid(w_psi . p + b_psi): third tiny MXU dot, EUP sigmoid on a
    # lane-dense (1, tile_s) row.
    # TODO(synk): if the 1-of-8-sublane sigmoid row ever binds on v7x, densify it
    # to (8, tile_s//8) before the sigmoid and broadcast back.
    psi_pre = (jnp.dot(wpsiT_ref[...], p, preferred_element_type=jnp.float32)
               + bpsi_ref[...])               # (1, tile_s)
    psi = jax.nn.sigmoid(psi_pre)

    # Gate the skip connection.
    o_ref[0] = (x * psi).astype(o_ref.dtype)


def _round_up(v, m):
    return ((v + m - 1) // m) * m


def _vmem_capacity_bytes():
    """Generation-aware VMEM capacity (v5e/v6e 128 MiB, v7x 64 MiB/TC)."""
    try:
        return int(pltpu.get_tpu_info().vmem_capacity_bytes)
    except Exception:
        return 64 * 1024 * 1024   # conservative fallback (v7x per-TC)


def _pick_tile_s(S, F_g, F_l, F_int, storage_bytes, budget_bytes):
    """Largest 128-multiple lane tile that fits the VMEM budget.

    No "must divide S" requirement anymore -- ragged last tiles are handled by
    Pallas' edge-block masking, so awkward volume sizes can no longer collapse
    the tile to 128 lanes (a measured ~3x regression).
    """
    # Per-lane footprint: double-buffered g/x/out blocks (storage dtype) plus f32
    # compute intermediates (casts, acc/relu, psi).
    per_lane = (2 * (F_g + 2 * F_l) * storage_bytes
                + (F_g + F_l + 2 * F_int + 4) * 4)
    max_tile = max(512, (budget_bytes // per_lane) // 128 * 128)
    return min(_round_up(S, 128), max_tile)


def attention_block_pallas(g, x, params, *, storage_dtype=jnp.bfloat16,
                           vmem_budget_bytes=None):
    """g: (N, F_g, D, H, W), x: (N, F_l, D, H, W). params: folded conv/BN weights.

    storage_dtype controls the HBM-streamed dtype of g/x/out (bf16 by default,
    halving bandwidth on this memory-bound op); compute is always f32.
    """
    N, F_g, D, H, W = g.shape
    _, F_l, _, _, _ = x.shape
    F_int = params["wgT"].shape[0]
    S = D * H * W
    storage_bytes = jnp.dtype(storage_dtype).itemsize

    capacity = _vmem_capacity_bytes()
    budget = vmem_budget_bytes if vmem_budget_bytes is not None else capacity // 4
    vmem_limit = min(capacity // 2, 64 * 1024 * 1024)

    # Free reshapes (channels already precede spatial in NCDHW) -- no transpose.
    g3 = g.reshape(N, F_g, S).astype(storage_dtype)
    x3 = x.reshape(N, F_l, S).astype(storage_dtype)

    tile_s = _pick_tile_s(S, F_g, F_l, F_int, storage_bytes, budget)
    n_s = pl.cdiv(S, tile_s)
    # v7x megacore: make sure both TensorCores get at least one comparable step.
    if N * n_s < 2 and tile_s >= 256:
        tile_s = _round_up(tile_s // 2, 128)
        n_s = pl.cdiv(S, tile_s)

    # No jnp.pad: the (possibly) ragged last spatial tile is an edge block --
    # Pallas clamps the DMAs, so out-of-range lanes never reach HBM and this
    # pointwise-per-lane computation cannot leak garbage into valid lanes.
    out3 = pl.pallas_call(
        _attention_kernel,
        out_shape=jax.ShapeDtypeStruct((N, F_l, S), storage_dtype),
        grid_spec=pltpu.PrefetchScalarGridSpec(
            num_scalar_prefetch=0,
            grid=(N, n_s),
            in_specs=[
                pl.BlockSpec((1, F_g, tile_s), lambda n, s: (n, 0, s)),
                pl.BlockSpec((1, F_l, tile_s), lambda n, s: (n, 0, s)),
                pl.BlockSpec((F_int, F_g), lambda n, s: (0, 0)),
                pl.BlockSpec((F_int, F_l), lambda n, s: (0, 0)),
                pl.BlockSpec((F_int, 1), lambda n, s: (0, 0)),
                pl.BlockSpec((1, F_int), lambda n, s: (0, 0)),
                pl.BlockSpec((1, 1), lambda n, s: (0, 0)),
            ],
            out_specs=pl.BlockSpec((1, F_l, tile_s), lambda n, s: (n, 0, s)),
        ),
        compiler_params=pltpu.CompilerParams(
            dimension_semantics=("parallel", "parallel"),
            vmem_limit_bytes=vmem_limit,
        ),
    )(g3, x3, params["wgT"], params["wxT"], params["b"],
      params["wpsiT"], params["bpsi"])

    return out3.reshape(N, F_l, D, H, W)


def make_params(key, F_g, F_l, F_int, eps=1e-5):
    """Deterministic params; BN (inference, running mean=0, var=1) folded into conv."""
    ks = jax.random.split(key, 3)

    def conv_bn_fold(k, cin, cout):
        kw, kb, kg, kbt = jax.random.split(k, 4)
        w = jax.random.normal(kw, (cout, cin), jnp.float32) * 0.1   # PyTorch (out, in)
        b = jax.random.normal(kb, (cout,), jnp.float32) * 0.1
        gamma = 1.0 + 0.1 * jax.random.normal(kg, (cout,), jnp.float32)
        beta = 0.1 * jax.random.normal(kbt, (cout,), jnp.float32)
        running_mean = jnp.zeros((cout,), jnp.float32)
        running_var = jnp.ones((cout,), jnp.float32)
        scale = gamma / jnp.sqrt(running_var + eps)
        return w * scale[:, None], (b - running_mean) * scale + beta

    wgT, bg = conv_bn_fold(ks[0], F_g, F_int)         # (F_int, F_g)
    wxT, bx = conv_bn_fold(ks[1], F_l, F_int)         # (F_int, F_l)
    wpsi, bpsi = conv_bn_fold(ks[2], F_int, 1)        # (1, F_int), (1,)

    return dict(
        wgT=wgT,
        wxT=wxT,
        b=(bg + bx).reshape(F_int, 1),                # biases of both branches combined
        wpsiT=wpsi.reshape(1, F_int),
        bpsi=bpsi.reshape(1, 1),
    )


def reference(g, x, p, storage_dtype=jnp.float32):
    """Plain-JAX reference in the same (folded-BN, inference) semantics, with the
    same storage-dtype rounding of the streamed tensors as the kernel."""
    N, F_g, D, H, W = g.shape
    F_l = x.shape[1]
    g3 = g.reshape(N, F_g, -1).astype(storage_dtype).astype(jnp.float32)
    x3 = x.reshape(N, F_l, -1).astype(storage_dtype).astype(jnp.float32)
    pre = (jnp.einsum('oc,ncs->nos', p["wgT"], g3)
           + jnp.einsum('oc,ncs->nos', p["wxT"], x3)
           + p["b"][None, :, :])
    act = jnp.maximum(pre, 0.0)
    psi = jax.nn.sigmoid(jnp.einsum('c,ncs->ns', p["wpsiT"][0], act)
                         + p["bpsi"][0, 0])
    out = x3 * psi[:, None, :]
    return out.reshape(x.shape).astype(storage_dtype)


if __name__ == "__main__":
    key = jax.random.PRNGKey(0)
    kg, kx, kp = jax.random.split(key, 3)

    # Small shapes consistent with the module: F_g = F_l = 4, F_int = 8
    N, F_g, F_l, F_int = 2, 4, 4, 8
    D = H = W = 16          # S = D*H*W = 4096 lane-dense spatial positions / sample

    g = jax.random.normal(kg, (N, F_g, D, H, W), jnp.float32)
    x = jax.random.normal(kx, (N, F_l, D, H, W), jnp.float32)
    params = make_params(kp, F_g, F_l, F_int)

    # 1) f32 storage path.  Tolerance accounts for TPU default-precision matmul
    #    (bf16 passes) on both the kernel and the XLA reference side.
    out_f32 = jax.block_until_ready(
        attention_block_pallas(g, x, params, storage_dtype=jnp.float32))
    ref_f32 = reference(g, x, params, storage_dtype=jnp.float32)
    assert out_f32.shape == x.shape
    assert jnp.allclose(out_f32.astype(jnp.float32), ref_f32.astype(jnp.float32),
                        atol=1e-2, rtol=1e-2), "f32 mismatch vs reference"

    # 2) bf16 storage path (default; halves HBM traffic).  Looser tolerance vs a
    #    reference computed from the same bf16-rounded inputs.
    out_bf16 = jax.block_until_ready(attention_block_pallas(g, x, params))
    ref_bf16 = reference(g, x, params, storage_dtype=jnp.bfloat16)
    assert out_bf16.shape == x.shape
    assert jnp.allclose(out_bf16.astype(jnp.float32), ref_bf16.astype(jnp.float32),
                        atol=3e-2, rtol=3e-2), "bf16 mismatch vs reference"

    print("KERNEL_OK")
</pallas_src>

<mosaic_0001>
module attributes {stable_mosaic.version = 11 : i64} {
  func.func @_attention_kernel(%arg0: i32, %arg1: i32, %arg2: memref<1x4x4096xf32, #tpu.memory_space<vmem>>, %arg3: memref<1x4x4096xf32, #tpu.memory_space<vmem>>, %arg4: memref<8x4xf32, #tpu.memory_space<vmem>>, %arg5: memref<8x4xf32, #tpu.memory_space<vmem>>, %arg6: memref<8x1xf32, #tpu.memory_space<vmem>>, %arg7: memref<1x8xf32, #tpu.memory_space<vmem>>, %arg8: memref<1x1xf32, #tpu.memory_space<vmem>>, %arg9: memref<1x4x4096xf32, #tpu.memory_space<vmem>>) attributes {dimension_semantics = [#tpu.dimension_semantics<parallel>, #tpu.dimension_semantics<parallel>], iteration_bounds = array<i64: 2, 1>, scalar_prefetch = 0 : i64, scratch_operands = 0 : i64, tpu.core_type = #tpu.core_type<tc>, window_params = [{transform_indices = @transform_0, window_bounds = array<i64: 1, 4, 4096>}, {transform_indices = @transform_1, window_bounds = array<i64: 1, 4, 4096>}, {pipeline_mode = #tpu.pipeline_mode<synchronous>, transform_indices = @transform_2, window_bounds = array<i64: 8, 4>}, {pipeline_mode = #tpu.pipeline_mode<synchronous>, transform_indices = @transform_3, window_bounds = array<i64: 8, 4>}, {pipeline_mode = #tpu.pipeline_mode<synchronous>, transform_indices = @transform_4, window_bounds = array<i64: 8, 1>}, {pipeline_mode = #tpu.pipeline_mode<synchronous>, transform_indices = @transform_5, window_bounds = array<i64: 1, 8>}, {pipeline_mode = #tpu.pipeline_mode<synchronous>, transform_indices = @transform_6, window_bounds = array<i64: 1, 1>}, {transform_indices = @transform_7, window_bounds = array<i64: 1, 4, 4096>}]} {
    %c0 = arith.constant 0 : index
    %c0_0 = arith.constant 0 : index
    %c0_1 = arith.constant 0 : index
    %0 = vector.load %arg2[%c0, %c0_0, %c0_1] : memref<1x4x4096xf32, #tpu.memory_space<vmem>>, vector<1x4x4096xf32>
    %1 = vector.shape_cast %0 : vector<1x4x4096xf32> to vector<4x4096xf32>
    %c0_2 = arith.constant 0 : index
    %c0_3 = arith.constant 0 : index
    %c0_4 = arith.constant 0 : index
    %2 = vector.load %arg3[%c0_2, %c0_3, %c0_4] : memref<1x4x4096xf32, #tpu.memory_space<vmem>>, vector<1x4x4096xf32>
    %3 = vector.shape_cast %2 : vector<1x4x4096xf32> to vector<4x4096xf32>
    %c0_5 = arith.constant 0 : index
    %c0_6 = arith.constant 0 : index
    %4 = vector.load %arg4[%c0_5, %c0_6] : memref<8x4xf32, #tpu.memory_space<vmem>>, vector<8x4xf32>
    %cst = arith.constant dense<0.000000e+00> : vector<8x4096xf32>
    %5 = tpu.matmul %4, %1, %cst {dimension_numbers = #tpu.dot_dimension_numbers<[1], [0], [0], [1], [0, 0, 1, 1], [], []>} : vector<8x4xf32>, vector<4x4096xf32>, vector<8x4096xf32> -> vector<8x4096xf32>
    %c0_7 = arith.constant 0 : index
    %c0_8 = arith.constant 0 : index
    %6 = vector.load %arg5[%c0_7, %c0_8] : memref<8x4xf32, #tpu.memory_space<vmem>>, vector<8x4xf32>
    %cst_9 = arith.constant dense<0.000000e+00> : vector<8x4096xf32>
    %7 = tpu.matmul %6, %3, %cst_9 {dimension_numbers = #tpu.dot_dimension_numbers<[1], [0], [0], [1], [0, 0, 1, 1], [], []>} : vector<8x4xf32>, vector<4x4096xf32>, vector<8x4096xf32> -> vector<8x4096xf32>
    %8 = arith.addf %5, %7 : vector<8x4096xf32>
    %c0_10 = arith.constant 0 : index
    %c0_11 = arith.constant 0 : index
    %9 = vector.load %arg6[%c0_10, %c0_11] : memref<8x1xf32, #tpu.memory_space<vmem>>, vector<8x1xf32>
    %10 = vector.broadcast %9 : vector<8x1xf32> to vector<8x4096xf32>
    %11 = arith.addf %8, %10 : vector<8x4096xf32>
    %cst_12 = arith.constant 0.000000e+00 : f32
    %12 = vector.broadcast %cst_12 : f32 to vector<8x4096xf32>
    %13 = arith.maximumf %11, %12 : vector<8x4096xf32>
    %c0_13 = arith.constant 0 : index
    %c0_14 = arith.constant 0 : index
    %14 = vector.load %arg7[%c0_13, %c0_14] : memref<1x8xf32, #tpu.memory_space<vmem>>, vector<1x8xf32>
    %cst_15 = arith.constant dense<0.000000e+00> : vector<1x4096xf32>
    %15 = tpu.matmul %14, %13, %cst_15 {dimension_numbers = #tpu.dot_dimension_numbers<[1], [0], [0], [1], [0, 0, 1, 1], [], []>} : vector<1x8xf32>, vector<8x4096xf32>, vector<1x4096xf32> -> vector<1x4096xf32>
    %c0_16 = arith.constant 0 : index
    %c0_17 = arith.constant 0 : index
    %16 = vector.load %arg8[%c0_16, %c0_17] : memref<1x1xf32, #tpu.memory_space<vmem>>, vector<1x1xf32>
    %17 = vector.broadcast %16 : vector<1x1xf32> to vector<1x4096xf32>
    %18 = arith.addf %15, %17 : vector<1x4096xf32>
    %19 = arith.negf %18 : vector<1x4096xf32>
    %20 = math.exp %19 : vector<1x4096xf32>
    %cst_18 = arith.constant 1.000000e+00 : f32
    %21 = vector.broadcast %cst_18 : f32 to vector<1x4096xf32>
    %22 = arith.addf %21, %20 : vector<1x4096xf32>
    %23 = arith.divf %21, %22 : vector<1x4096xf32>
    %24 = vector.broadcast %23 : vector<1x4096xf32> to vector<4x4096xf32>
    %25 = arith.mulf %3, %24 : vector<4x4096xf32>
    %c0_19 = arith.constant 0 : index
    %c0_20 = arith.constant 0 : index
    %c0_21 = arith.constant 0 : index
    %26 = vector.load %arg9[%c0_19, %c0_20, %c0_21] : memref<1x4x4096xf32, #tpu.memory_space<vmem>>, vector<1x4x4096xf32>
    %27 = vector.shape_cast %26 : vector<1x4x4096xf32> to vector<4x4096xf32>
    %28 = vector.shape_cast %25 : vector<4x4096xf32> to vector<1x4x4096xf32>
    tpu.vector_store %arg9[%c0_19, %c0_20, %c0_21], %28 {strides = array<i32>} : memref<1x4x4096xf32, #tpu.memory_space<vmem>>, vector<1x4x4096xf32>,
    return
  }
  func.func @transform_0(%arg0: i32, %arg1: i32) -> (i32, i32, i32) {
    %c0_i32 = arith.constant 0 : i32
    %c0_i32_0 = arith.constant 0 : i32
    return %arg0, %c0_i32, %arg1 : i32, i32, i32
  }
  func.func @transform_1(%arg0: i32, %arg1: i32) -> (i32, i32, i32) {
    %c0_i32 = arith.constant 0 : i32
    %c0_i32_0 = arith.constant 0 : i32
    return %arg0, %c0_i32, %arg1 : i32, i32, i32
  }
  func.func @transform_2(%arg0: i32, %arg1: i32) -> (i32, i32) {
    %c0_i32 = arith.constant 0 : i32
    %c0_i32_0 = arith.constant 0 : i32
    %c0_i32_1 = arith.constant 0 : i32
    return %c0_i32, %c0_i32_0 : i32, i32
  }
  func.func @transform_3(%arg0: i32, %arg1: i32) -> (i32, i32) {
    %c0_i32 = arith.constant 0 : i32
    %c0_i32_0 = arith.constant 0 : i32
    %c0_i32_1 = arith.constant 0 : i32
    return %c0_i32, %c0_i32_0 : i32, i32
  }
  func.func @transform_4(%arg0: i32, %arg1: i32) -> (i32, i32) {
    %c0_i32 = arith.constant 0 : i32
    %c0_i32_0 = arith.constant 0 : i32
    %c0_i32_1 = arith.constant 0 : i32
    return %c0_i32, %c0_i32_0 : i32, i32
  }
  func.func @transform_5(%arg0: i32, %arg1: i32) -> (i32, i32) {
    %c0_i32 = arith.constant 0 : i32
    %c0_i32_0 = arith.constant 0 : i32
    %c0_i32_1 = arith.constant 0 : i32
    return %c0_i32, %c0_i32_0 : i32, i32
  }
  func.func @transform_6(%arg0: i32, %arg1: i32) -> (i32, i32) {
    %c0_i32 = arith.constant 0 : i32
    %c0_i32_0 = arith.constant 0 : i32
    %c0_i32_1 = arith.constant 0 : i32
    return %c0_i32, %c0_i32_0 : i32, i32
  }
  func.func @transform_7(%arg0: i32, %arg1: i32) -> (i32, i32, i32) {
    %c0_i32 = arith.constant 0 : i32
    %c0_i32_0 = arith.constant 0 : i32
    return %arg0, %c0_i32, %arg1 : i32, i32, i32
  }
}

</mosaic_0001>

<bundles_post_ra>
// kernel: tpu_custom_call.1
= control target key start
LH: loop header
LB: loop body
LE: loop exit
PB: predicated region body
PF: predicated region fallthrough
CT: control target
= control target key end

     0   :  { %s5916_s0 = inlined_call_operand.hbm [shape: f32[2,4,4096], index: 0, kind: input, shape index: {}]   ;;  %s5917_s1 = inlined_call_operand.hbm [shape: f32[2,4,4096], index: 1, kind: input, shape index: {}]   ;;  %s5918_s2 = inlined_call_operand.vmem [shape: f32[8,4], index: 2, kind: input, shape index: {}]   ;;  %s5919_s3 = inlined_call_operand.vmem [shape: f32[8,4], index: 3, kind: input, shape index: {}]   ;;  %s5920_s4 = inlined_call_operand.vmem [shape: f32[8,1], index: 4, kind: input, shape index: {}]   ;;  %s5921_s5 = inlined_call_operand.vmem [shape: f32[1,8], index: 5, kind: input, shape index: {}]   ;;  %s5922_s6 = inlined_call_operand.<no memory space> [shape: f32[1,1], index: 6, kind: input, shape index: {}]   ;;  %s5923_s7 = inlined_call_operand.hbm [shape: f32[2,4,4096], index: 7, kind: output, shape index: {}]  }
   0x1   :  { %5927 = sst [smem:[#allocation12_spill]] %s5916_s0  ;;  %v12_v0 = vstv %s5922_s6 }
   0x2   :  { %13 = vst [vmem:[#allocation2] sm:$0x1] %v12_v0 }
   0x3   :  { %14 = vsyncpa [#allocation4], 0 }
   0x4   :  { %16 = vsyncpa [#allocation4 + $0x1], 0 }
   0x5   :  { %17 = vsyncpa [#allocation7], 0 }
   0x6   :  { %19 = vsyncpa [#allocation7 + $0x1], 0 }
   0x7   :  { %20 = vsyncpa [#allocation5], 0 }
   0x8   :  { %22 = vsyncpa [#allocation5 + $0x1], 0  ;;  %s5270_s26 = smov 0   ;;  %s5272_s27 = smov 0  }
   0x9   :  { %s5274_s28 = smov 0   ;;  %s5276_s29 = smov 0  }
   0xa   :  { %s5278_s30 = smov 0   ;;  %s5280_s8 = smov 0  }
   0xb LB: > { %s4630_s6 = sadd.s32 4294967295, %s5220_s8   ;;  %s4631_s9 = sadd.s32 4294967294, %s5220_s8   ;;  %s5220_s8 = sphi %s5280_s8, %s28_s8   ;;  %s5216_s30 = sphi %s5278_s30, %s5947_s30   ;;  %s5212_s29 = sphi %s5276_s29, %s5946_s29   ;;  %s5208_s28 = sphi %s5274_s28, %s5945_s28   ;;  %s5204_s27 = sphi %s5272_s27, %s5944_s27   ;;  %s5200_s26 = sphi %s5270_s26, %s5943_s26  }
   0xc   : > { %s40_s10 = sadd.s32 1, %s5216_s30  ;;  %s49_s11 = sadd.s32 1, %s5208_s28 }
   0xd   : > { %p42_p0 = scmp.ge.s32.totalorder %s40_s10, 2  ;;  %p56_p1 = scmp.ne.s32.totalorder %s5208_s28, %s5204_s27 }
   0xe   : > { %p57_p2 = scmp.eq.s32.totalorder %s5220_s8, 0  ;;  %p62_p3 = scmp.ne.s32.totalorder %s5204_s27, %s5200_s26 }
   0xf   : > { %s5949_s10 = smov (%p42_p0, %s40_s10), 0  ;;  %p63_p5 = scmp.eq.s32.totalorder %s4630_s6, 0 }
  0x10   : > { %p5311_p4 = por %p57_p2, %p56_p1  ;;  %s44_s13 = ssub.s32 %s5216_s30, %s5949_s10 }
  0x11   : > { %p221_p6 = scmp.eq.s32.totalorder %s4630_s6, 1  ;;  %p47_p7 = scmp.eq.s32.totalorder %s44_s13, 0 }
  0x12   : > { %p5317_p8 = por %p63_p5, %p62_p3  ;;  %p227_p10 = scmp.eq.s32.totalorder %s4631_s9, 1 }
  0x13   : > { %p5321_p9 = por %p221_p6, %p56_p1  ;;  %p4845_p13 = scmp.lt.s32.totalorder %s5220_s8, 2 }
  0x14   : > { %s5929_s14 = scalar_select %p5317_p8, 1, 0 }
  0x15   : > { %s5930_s15 = scalar_select %p5321_p9, 1, 0 }
  0x16   : > { %s5326_s16 = scalar_select %p47_p7, %s5208_s28, %s49_s11  }
  0x17   : > { %p5328_p11 = por %p227_p10, %p62_p3  ;;  %s5335_s18 = sand.u32 1, %s5208_s28  }
  0x18   : > { %s5924_s19 = sshll.u32 %s5335_s18, 7  ;;  %s4793_s20 = sshll.u32 %s5216_s30, 11 }
  0x19   : > { %s5931_s17 = scalar_select %p5328_p11, 1, 0 }
  0x1a   : > { %s5932_s0 = sld [smem:[#allocation12_spill]]  ;;  %s266_s24 = scalar_lea.vmem [#allocation3], %s5924_s19 }
  0x1b   : > { %s276_s25 = sshll.u32 %s266_s24, 4  ;;  %p5352_p0 = pnand %p4845_p13, %p5311_p4  ;;  %s5348_s25 = int_to_ptr.vmem [resolvable:$true] %s276_s25 }
  0x1c   : > { %s263_s9 = scalar_lea.sflag [#allocation4], %s5335_s18 }
  0x1d   : > { %p5076_p5 = pneg %p5352_p0 }
  0x20   : > { %s5344_s23 = scalar_lea.hbm %s5932_s0, %s4793_s20  ;;  %s5079_s12 = scalar_lea.hbm %s5932_s0, 4096 }
  0x21   : > { %s5074_s11 = scalar_lea.hbm %s5344_s23, 2048  ;;  %p5080_p4 = scmp.lt.u32.totalorder %s5344_s23, %s5932_s0 }
  0x22   : > { %p5075_p3 = scmp.ne.s32.totalorder %s5344_s23, %s5074_s11  ;;  %p5081_p10 = scmp.lt.u32.totalorder %s5079_s12, %s5074_s11 }
  0x23   : > { %p5083_p12 = scmp.lt.u32.totalorder %s5074_s11, %s5344_s23 }
  0x24   : > { %p5077_p6 = pnand %p5076_p5, %p5075_p3  ;;  %p5082_p13 = por %p5081_p10, %p5080_p4 }
  0x26   : > { %p5078_p7 = pneg %p5077_p6  ;;  %p5084_p1 = por %p5083_p12, %p5082_p13 }
  0x28   : > { %p5085_p2 = pnand %p5084_p1, %p5078_p7 }
  0x2a   : > { %5088 = shalt.err (!%p5085_p2)
}
  0x2b   : > { %s5089_s19 = scalar_lea.vmem %s5348_s25, 2048  ;;  %s5222_s13 = smov [#allocation3]  }
  0x2c   : > { %p5090_p3 = scmp.ne.s32.totalorder %s5348_s25, %s5089_s19  ;;  %s5094_s21 = sshll.u32 %s5222_s13, 4  ;;  %s5095_s21 = int_to_ptr.vmem [resolvable:$false] %s5094_s21 }
  0x2d   : > { %s5096_s22 = scalar_lea.vmem %s5095_s21, 4096  ;;  %p5097_p9 = scmp.lt.s32.totalorder %s5348_s25, %s5095_s21 }
  0x2e   : > { %p5092_p6 = pnand %p5090_p3, %p5076_p5  ;;  %p5098_p4 = scmp.lt.s32.totalorder %s5096_s22, %s5089_s19 }
  0x30   : > { %p5093_p11 = pneg %p5092_p6  ;;  %p5099_p10 = por %p5098_p4, %p5097_p9 }
  0x32   : > { %p5100_p12 = pnand %p5099_p10, %p5093_p11 }
  0x34   : > { %5103 = shalt.err (!%p5100_p12)
}
  0x35   : > { %4837 = dma.hbm_to_vmem [thread:$0]  (!%p5352_p0), %s5344_s23, 2048, %s5348_s25, %s263_s9  }
  0x36   : > { %p5934_p1 = scmp.lt.s32.totalorder %s5220_s8, 3  ;;  %p5935_p2 = scmp.ge.s32.totalorder %s5220_s8, 1 }
  0x37   : > { %s5397_s24 = scalar_lea.hbm %s5917_s1, %s4793_s20  ;;  %s5937_s13 = sshll.u32 %s5335_s18, 7 }
  0x38   : > { %p5388_p7 = pnand %p5935_p2, %p5934_p1  ;;  %s287_s21 = scalar_lea.vmem [#allocation6], %s5937_s13 }
  0x39   : > { %s297_s22 = sshll.u32 %s287_s21, 4  ;;  %s284_s23 = scalar_lea.sflag [#allocation7], %s5335_s18  ;;  %s298_s22 = int_to_ptr.vmem [resolvable:$true] %s297_s22 }
  0x3a   : > { %s5936_s11 = scalar_select %p5388_p7, 1, 0 }
  0x3b   : > { %s5104_s25 = scalar_lea.hbm %s5397_s24, 2048  ;;  %s5109_s20 = scalar_lea.hbm %s5917_s1, 4096 }
  0x3c   : > { %p5105_p9 = scmp.ne.s32.totalorder %s5397_s24, %s5104_s25  ;;  %p5110_p3 = scmp.lt.u32.totalorder %s5397_s24, %s5917_s1 }
  0x3d   : > { %p5111_p6 = scmp.lt.u32.totalorder %s5109_s20, %s5104_s25  ;;  %p5113_p10 = scmp.lt.u32.totalorder %s5104_s25, %s5397_s24 }
  0x3e   : > { %p5107_p11 = pnand %p5105_p9, %p5076_p5 }
  0x3f   : > { %p5112_p4 = por %p5111_p6, %p5110_p3 }
  0x40   : > { %p5108_p13 = pneg %p5107_p11 }
  0x41   : > { %p5114_p12 = por %p5113_p10, %p5112_p4 }
  0x43   : > { %p5115_p1 = pnand %p5114_p12, %p5108_p13 }
  0x45   : > { %5118 = shalt.err (!%p5115_p1)
}
  0x46   : > { %s5119_s18 = scalar_lea.vmem %s298_s22, 2048  ;;  %s5223_s13 = smov [#allocation6]  }
  0x47   : > { %p5120_p2 = scmp.ne.s32.totalorder %s298_s22, %s5119_s18  ;;  %s5124_s0 = sshll.u32 %s5223_s13, 4  ;;  %s5125_s0 = int_to_ptr.vmem [resolvable:$false] %s5124_s0 }
  0x48   : > { %s5126_s21 = scalar_lea.vmem %s5125_s0, 4096  ;;  %p5127_p8 = scmp.lt.s32.totalorder %s298_s22, %s5125_s0 }
  0x49   : > { %p5122_p9 = pnand %p5120_p2, %p5076_p5  ;;  %p5128_p7 = scmp.lt.s32.totalorder %s5126_s21, %s5119_s18 }
  0x4b   : > { %p5123_p11 = pneg %p5122_p9  ;;  %p5129_p3 = por %p5128_p7, %p5127_p8 }
  0x4d   : > { %p5130_p6 = pnand %p5129_p3, %p5123_p11 }
  0x4f   : > { %5133 = shalt.err (!%p5130_p6)
}
  0x50   : > { %4840 = dma.hbm_to_vmem [thread:$0]  (!%p5352_p0), %s5397_s24, 2048, %s298_s22, %s284_s23  }
  0x51   : > { %p5938_p13 = scmp.ne.s32.totalorder %s5936_s11, 0 }
  0x52   : > { %s5424_s25 = sand.u32 (!%p5938_p13), 1, %s5204_s27   ;;  %p5939_p8 = scmp.ne.s32.totalorder (!%p5938_p13), %s5929_s14, 0 }
  0x53   : > { %306 = sbr.rel (%p5938_p13) target bundleno = 664 (0x298), region = 48  ;;  %s5427_s9 = sshll.u32 (!%p5938_p13), %s5424_s25, 7 }
  0x54   : > { %s309_s20 = scalar_lea.sflag (!%p5938_p13), [#allocation4], %s5424_s25  ;;  %s5431_s19 = scalar_lea.vmem (!%p5938_p13), [#allocation3], %s5427_s9 }
  0x5a   : > { %5187 = dma.done.wait (%p5939_p8), %s309_s20, 2048  }
  0x5b   : > { %5189 = vsyncadd (%p5939_p8), %s309_s20, 4294965248  ;;  %s318_s6 = scalar_lea.sflag [#allocation7], %s5424_s25  ;;  %s5439_s11 = scalar_lea.vmem [#allocation6], %s5427_s9 }
  0x5c   : > { %5191 = dma.done.wait (%p5939_p8), %s318_s6, 2048  }
  0x5d   : > { %5193 = vsyncadd (%p5939_p8), %s318_s6, 4294965248  ;;  %v5224_v1 = vmov 0.0   ;;  %v5225_v2 = vmov 0   ;;  %v376_v3 = vld [vmem:[%s5439_s11] sm:$0xff]  ;;  %vm430_vm0 = vcmask 1043456   ;;  %v377_v4 = vld [vmem:[%s5439_s11 + $0x8] sm:$0xff] }
  0x5e   : > { %559 = vmatprep.mubr.f32.mxu0 %v5224_v1  ;;  %630 = vmatprep.mubr.f32.mxu1 %v5224_v1  ;;  %v410_v5 = vcombine.high %v376_v3, %v376_v3  ;;  %v411_v6 = vcombine.high %v377_v4, %v377_v4  ;;  %v378_v7 = vld [vmem:[%s5439_s11 + $0x10] sm:$0xff]  ;;  %v379_v8 = vld [vmem:[%s5439_s11 + $0x18] sm:$0xff]  ;;  %vm426_vm1 = vcmask 31744   ;;  %v380_v12 = vld [vmem:[%s5439_s11 + $0x20] sm:$0xff]  ;;  %vm2947_vm2 = vcmask 64512   ;;  %s5791_s21 = scalar_lea.vmem [#allocation8], %s5427_s9 }
  0x5f   : > { %4897 = vset.pattern.permute.xlu0 %v5225_v2  ;;  %v5454_v9 = vld [vmem:[%s5919_s3] sm:$0xff]  ;;  %v412_v10 = vcombine.high %v378_v7, %v378_v7  ;;  %v413_v11 = vcombine.high %v379_v8, %v379_v8  ;;  %v381_v13 = vld [vmem:[%s5439_s11 + $0x28] sm:$0xff]  ;;  %v414_v14 = vcombine.high %v380_v12, %v380_v12  ;;  %v382_v16 = vld [vmem:[%s5439_s11 + $0x30] sm:$0xff]  ;;  %s4795_s9 = sshll.u32 %s5212_s29, 11  ;;  %s4520_s20 = sshll.u32 %s5791_s21, 4  ;;  %s5867_s20 = int_to_ptr.vmem [resolvable:$true] %s4520_s20 }
  0x60   : > { %4644 = vmatprep.subr.msk.mxu0 %vm430_vm0, %v410_v5  ;;  %4647 = vmatprep.subr.msk.mxu1 %vm430_vm0, %v411_v6  ;;  %v415_v15 = vcombine.high %v381_v13, %v381_v13  ;;  %v383_v17 = vld [vmem:[%s5439_s11 + $0x38] sm:$0xff]  ;;  %v416_v18 = vcombine.high %v382_v16, %v382_v16  ;;  %v384_v20 = vld [vmem:[%s5439_s11 + $0x40] sm:$0xff]  ;;  %v385_v21 = vld [vmem:[%s5439_s11 + $0x48] sm:$0xff]  ;;  %s5865_s14 = scalar_lea.hbm %s5923_s7, %s4795_s9  ;;  %s4504_s29 = scalar_lea.sflag [#allocation5], %s5424_s25 }
  0x61   : > { %4645 = vmatpush1.msk.msra.mxu0 %vm430_vm0, %v376_v3  ;;  %4648 = vmatpush1.msk.msra.mxu1 %vm430_vm0, %v377_v4  ;;  %v417_v19 = vcombine.high %v383_v17, %v383_v17  ;;  %v418_v22 = vcombine.high %v384_v20, %v384_v20  ;;  %v419_v23 = vcombine.high %v385_v21, %v385_v21  ;;  %v386_v24 = vld [vmem:[%s5439_s11 + $0x50] sm:$0xff]  ;;  %v387_v25 = vld [vmem:[%s5439_s11 + $0x58] sm:$0xff]  ;;  %v388_v28 = vld [vmem:[%s5439_s11 + $0x60] sm:$0xff]  ;;  %s5134_s24 = scalar_lea.vmem %s5867_s20, 2048  ;;  %p5940_p5 = scmp.ne.s32.totalorder %s5930_s15, 0 }
  0x62   : > { %4646 = vmatmul.mubr.msk.f32.vlgmr.msra.gmra.mrb[0].mxu0 %vm426_vm1, %v5454_v9  ;;  %4649 = vmatmul.mubr.msk.f32.vlgmr.msra.gmra.mrb[0].mxu1 %vm426_vm1, %v5454_v9  ;;  %v420_v26 = vcombine.high %v386_v24, %v386_v24  ;;  %v421_v27 = vcombine.high %v387_v25, %v387_v25  ;;  %v389_v29 = vld [vmem:[%s5439_s11 + $0x68] sm:$0xff]  ;;  %v422_v30 = vcombine.high %v388_v28, %v388_v28  ;;  %v390_v32 = vld [vmem:[%s5439_s11 + $0x70] sm:$0xff]  ;;  %v391_v33 = vld [vmem:[%s5439_s11 + $0x78] sm:$0xff]  ;;  %p5135_p0 = scmp.ne.s32.totalorder %s5867_s20, %s5134_s24 }
  0x63   : > { %4650 = vmatprep.subr.msk.mxu0 %vm430_vm0, %v412_v10  ;;  %4653 = vmatprep.subr.msk.mxu1 %vm430_vm0, %v413_v11  ;;  %v423_v31 = vcombine.high %v389_v29, %v389_v29  ;;  %v424_v34 = vcombine.high %v390_v32, %v390_v32  ;;  %v425_v35 = vcombine.high %v391_v33, %v391_v33  ;;  %v360_v36 = vld [vmem:[%s5431_s19] sm:$0xff]  ;;  %v361_v37 = vld [vmem:[%s5431_s19 + $0x8] sm:$0xff]  ;;  %v362_v40 = vld [vmem:[%s5431_s19 + $0x10] sm:$0xff] }
  0x64   : > { %4651 = vmatpush1.msk.msra.mxu0 %vm430_vm0, %v378_v7  ;;  %701 = vmatprep.mubr.f32.mxu0 %v5224_v1  ;;  %v1647_v38 = vcombine.high %v360_v36, %v360_v36  ;;  %v1648_v39 = vcombine.high %v361_v37, %v361_v37  ;;  %v363_v41 = vld [vmem:[%s5431_s19 + $0x18] sm:$0xff]  ;;  %v1649_v43 = vcombine.high %v362_v40, %v362_v40  ;;  %v364_v45 = vld [vmem:[%s5431_s19 + $0x20] sm:$0xff]  ;;  %v365_v46 = vld [vmem:[%s5431_s19 + $0x28] sm:$0xff]  ;;  %p5136_p7 = pnand %p5135_p0, %p5940_p5 }
  0x65   : > { %4654 = vmatpush1.msk.msra.mxu1 %vm430_vm0, %v379_v8  ;;  %772 = vmatprep.mubr.f32.mxu1 %v5224_v1  ;;  %v5555_v42 = vld [vmem:[%s5918_s2] sm:$0xff]  ;;  %v1650_v44 = vcombine.high %v363_v41, %v363_v41  ;;  %v1651_v47 = vcombine.high %v364_v45, %v364_v45  ;;  %v1652_v48 = vcombine.high %v365_v46, %v365_v46  ;;  %v366_v49 = vld [vmem:[%s5431_s19 + $0x30] sm:$0xff]  ;;  %v369_v54 = vld [vmem:[%s5431_s19 + $0x48] sm:$0xff] }
  0x66   : > { %4652 = vmatmul.mubr.msk.f32.vlgmr.msra.gmra.mrb[2].mxu0 %vm426_vm1, %v5454_v9  ;;  %4655 = vmatmul.mubr.msk.f32.vlgmr.msra.gmra.mrb[2].mxu1 %vm426_vm1, %v5454_v9  ;;  %v367_v50 = vld [vmem:[%s5431_s19 + $0x38] sm:$0xff]  ;;  %v1653_v51 = vcombine.high %v366_v49, %v366_v49  ;;  %v368_v53 = vld [vmem:[%s5431_s19 + $0x40] sm:$0xff]  ;;  %v1656_v56 = vcombine.high %v369_v54, %v369_v54  ;;  %v370_v57 = vld [vmem:[%s5431_s19 + $0x50] sm:$0xff]  ;;  %p5137_p4 = pneg %p5136_p7 }
  0x67   : > { %4656 = vmatprep.subr.msk.mxu0 %vm430_vm0, %v414_v14  ;;  %4659 = vmatprep.subr.msk.mxu1 %vm430_vm0, %v415_v15  ;;  %v1654_v52 = vcombine.high %v367_v50, %v367_v50  ;;  %v1655_v55 = vcombine.high %v368_v53, %v368_v53  ;;  %v371_v58 = vld [vmem:[%s5431_s19 + $0x58] sm:$0xff]  ;;  %v1657_v59 = vcombine.high %v370_v57, %v370_v57  ;;  %v372_v61 = vld [vmem:[%s5431_s19 + $0x60] sm:$0xff]  ;;  %v373_v62 = vld [vmem:[%s5431_s19 + $0x68] sm:$0xff] }
  0x68   : > { %4657 = vmatpush1.msk.msra.mxu0 %vm430_vm0, %v380_v12  ;;  %843 = vmatprep.mubr.f32.mxu0 %v5224_v1  ;;  %v1658_v60 = vcombine.high %v371_v58, %v371_v58  ;;  %v1659_v63 = vcombine.high %v372_v61, %v372_v61  ;;  %v1660_v0 = vcombine.high %v373_v62, %v373_v62  ;;  %v374_v2 = vld [vmem:[%s5431_s19 + $0x70] sm:$0xff]  ;;  %v375_v3 = vld [vmem:[%s5431_s19 + $0x78] sm:$0xff] }
  0x69   : > { %4660 = vmatpush1.msk.msra.mxu1 %vm430_vm0, %v381_v13  ;;  %914 = vmatprep.mubr.f32.mxu1 %v5224_v1  ;;  %v1661_v4 = vcombine.high %v374_v2, %v374_v2  ;;  %v1662_v5 = vcombine.high %v375_v3, %v375_v3  ;;  %v2866_v6 = vld [vmem:[%s5920_s4] sm:$0xff] }
  0x6a   : > { %4658 = vmatmul.mubr.msk.f32.vlgmr.msra.gmra.mrb[4].mxu0 %vm426_vm1, %v5454_v9  ;;  %4661 = vmatmul.mubr.msk.f32.vlgmr.msra.gmra.mrb[4].mxu1 %vm426_vm1, %v5454_v9  ;;  %v2937_v7 = vld [vmem:[#allocation2] sm:$0x1] }
  0x6b   : > { %4662 = vmatprep.subr.msk.mxu0 %vm430_vm0, %v416_v18  ;;  %4665 = vmatprep.subr.msk.mxu1 %vm430_vm0, %v417_v19 }
  0x6c   : > { %4663 = vmatpush1.msk.msra.mxu0 %vm430_vm0, %v382_v16  ;;  %985 = vmatprep.mubr.f32.mxu0 %v5224_v1 }
  0x6d   : > { %4666 = vmatpush1.msk.msra.mxu1 %vm430_vm0, %v383_v17  ;;  %1056 = vmatprep.mubr.f32.mxu1 %v5224_v1 }
  0x6e   : > { %4664 = vmatmul.mubr.msk.f32.vlgmr.msra.gmra.mrb[6].mxu0 %vm426_vm1, %v5454_v9  ;;  %4667 = vmatmul.mubr.msk.f32.vlgmr.msra.gmra.mrb[6].mxu1 %vm426_vm1, %v5454_v9 }
  0x6f   : > { %4668 = vmatprep.subr.msk.mxu0 %vm430_vm0, %v418_v22  ;;  %4671 = vmatprep.subr.msk.mxu1 %vm430_vm0, %v419_v23 }
  0x70   : > { %4669 = vmatpush1.msk.msra.mxu0 %vm430_vm0, %v384_v20  ;;  %1127 = vmatprep.mubr.f32.mxu0 %v5224_v1 }
  0x71   : > { %4672 = vmatpush1.msk.msra.mxu1 %vm430_vm0, %v385_v21  ;;  %1198 = vmatprep.mubr.f32.mxu1 %v5224_v1 }
  0x72   : > { %4670 = vmatmul.mubr.msk.f32.vlgmr.msra.gmra.mrb[8].mxu0 %vm426_vm1, %v5454_v9  ;;  %4673 = vmatmul.mubr.msk.f32.vlgmr.msra.gmra.mrb[8].mxu1 %vm426_vm1, %v5454_v9 }
  0x73   : > { %4674 = vmatprep.subr.msk.mxu0 %vm430_vm0, %v420_v26  ;;  %4677 = vmatprep.subr.msk.mxu1 %vm430_vm0, %v421_v27  ;;  %v5663_v27 = vld [vmem:[%s5921_s5] sm:$0x1] }
  0x74   : > { %4675 = vmatpush1.msk.msra.mxu0 %vm430_vm0, %v386_v24  ;;  %1269 = vmatprep.mubr.f32.mxu0 %v5224_v1 }
  0x75   : > { %4678 = vmatpush1.msk.msra.mxu1 %vm430_vm0, %v387_v25  ;;  %1340 = vmatprep.mubr.f32.mxu1 %v5224_v1 }
  0x76   : > { %4676 = vmatmul.mubr.msk.f32.vlgmr.msra.gmra.mrb[10].mxu0 %vm426_vm1, %v5454_v9  ;;  %4679 = vmatmul.mubr.msk.f32.vlgmr.msra.gmra.mrb[10].mxu1 %vm426_vm1, %v5454_v9 }
  0x77   : > { %4680 = vmatprep.subr.msk.mxu0 %vm430_vm0, %v422_v30  ;;  %4683 = vmatprep.subr.msk.mxu1 %vm430_vm0, %v423_v31 }
  0x78   : > { %4681 = vmatpush1.msk.msra.mxu0 %vm430_vm0, %v388_v28  ;;  %1411 = vmatprep.mubr.f32.mxu0 %v5224_v1 }
  0x79   : > { %4684 = vmatpush1.msk.msra.mxu1 %vm430_vm0, %v389_v29  ;;  %1482 = vmatprep.mubr.f32.mxu1 %v5224_v1 }
  0x7a   : > { %4682 = vmatmul.mubr.msk.f32.vlgmr.msra.gmra.mrb[12].mxu0 %vm426_vm1, %v5454_v9  ;;  %4685 = vmatmul.mubr.msk.f32.vlgmr.msra.gmra.mrb[12].mxu1 %vm426_vm1, %v5454_v9 }
  0x7b   : > { %4686 = vmatprep.subr.msk.mxu0 %vm430_vm0, %v424_v34  ;;  %4689 = vmatprep.subr.msk.mxu1 %vm430_vm0, %v425_v35 }
  0x7c   : > { %4687 = vmatpush1.msk.msra.mxu0 %vm430_vm0, %v390_v32  ;;  %1553 = vmatprep.mubr.f32.mxu0 %v5224_v1 }
  0x7d   : > { %4690 = vmatpush1.msk.msra.mxu1 %vm430_vm0, %v391_v33  ;;  %1624 = vmatprep.mubr.f32.mxu1 %v5224_v1 }
  0x7e   : > { %4688 = vmatmul.mubr.msk.f32.vlgmr.msra.gmra.mrb[14].mxu0 %vm426_vm1, %v5454_v9  ;;  %4691 = vmatmul.mubr.msk.f32.vlgmr.msra.gmra.mrb[14].mxu1 %vm426_vm1, %v5454_v9 }
  0x7f   : > { %4692 = vmatprep.subr.msk.mxu0 %vm430_vm0, %v1647_v38  ;;  %4695 = vmatprep.subr.msk.mxu1 %vm430_vm0, %v1648_v39 }
  0x80   : > { %4693 = vmatpush1.msk.msra.mxu0 %vm430_vm0, %v360_v36  ;;  %1794 = vmatprep.mubr.f32.mxu0 %v5224_v1 }
  0x81   : > { %4696 = vmatpush1.msk.msra.mxu1 %vm430_vm0, %v361_v37  ;;  %1865 = vmatprep.mubr.f32.mxu1 %v5224_v1 }
  0x82   : > { %4694 = vmatmul.mubr.msk.f32.vlgmr.msra.gmra.mrb[0].mxu0 %vm426_vm1, %v5555_v42  ;;  %4697 = vmatmul.mubr.msk.f32.vlgmr.msra.gmra.mrb[0].mxu1 %vm426_vm1, %v5555_v42 }
  0x83   : > { %4698 = vmatprep.subr.msk.mxu0 %vm430_vm0, %v1649_v43  ;;  %4701 = vmatprep.subr.msk.mxu1 %vm430_vm0, %v1650_v44 }
  0x84   : > { %4699 = vmatpush1.msk.msra.mxu0 %vm430_vm0, %v362_v40  ;;  %1936 = vmatprep.mubr.f32.mxu0 %v5224_v1 }
  0x85   : > { %4702 = vmatpush1.msk.msra.mxu1 %vm430_vm0, %v363_v41  ;;  %2007 = vmatprep.mubr.f32.mxu1 %v5224_v1 }
  0x86   : > { %4700 = vmatmul.mubr.msk.f32.vlgmr.msra.gmra.mrb[2].mxu0 %vm426_vm1, %v5555_v42  ;;  %4703 = vmatmul.mubr.msk.f32.vlgmr.msra.gmra.mrb[2].mxu1 %vm426_vm1, %v5555_v42 }
  0x87   : > { %4704 = vmatprep.subr.msk.mxu0 %vm430_vm0, %v1651_v47  ;;  %4707 = vmatprep.subr.msk.mxu1 %vm430_vm0, %v1652_v48 }
  0x88   : > { %4705 = vmatpush1.msk.msra.mxu0 %vm430_vm0, %v364_v45  ;;  %2078 = vmatprep.mubr.f32.mxu0 %v5224_v1 }
  0x89   : > { %4708 = vmatpush1.msk.msra.mxu1 %vm430_vm0, %v365_v46  ;;  %2149 = vmatprep.mubr.f32.mxu1 %v5224_v1 }
  0x8a   : > { %4706 = vmatmul.mubr.msk.f32.vlgmr.msra.gmra.mrb[4].mxu0 %vm426_vm1, %v5555_v42  ;;  %4709 = vmatmul.mubr.msk.f32.vlgmr.msra.gmra.mrb[4].mxu1 %vm426_vm1, %v5555_v42 }
  0x8b   : > { %4710 = vmatprep.subr.msk.mxu0 %vm430_vm0, %v1653_v51  ;;  %4713 = vmatprep.subr.msk.mxu1 %vm430_vm0, %v1654_v52 }
  0x8c   : > { %4711 = vmatpush1.msk.msra.mxu0 %vm430_vm0, %v366_v49  ;;  %2220 = vmatprep.mubr.f32.mxu0 %v5224_v1 }
  0x8d   : > { %4714 = vmatpush1.msk.msra.mxu1 %vm430_vm0, %v367_v50  ;;  %2291 = vmatprep.mubr.f32.mxu1 %v5224_v1 }
  0x8e   : > { %4712 = vmatmul.mubr.msk.f32.vlgmr.msra.gmra.mrb[6].mxu0 %vm426_vm1, %v5555_v42  ;;  %4715 = vmatmul.mubr.msk.f32.vlgmr.msra.gmra.mrb[6].mxu1 %vm426_vm1, %v5555_v42 }
  0x8f   : > { %4716 = vmatprep.subr.msk.mxu0 %vm430_vm0, %v1655_v55  ;;  %4719 = vmatprep.subr.msk.mxu1 %vm430_vm0, %v1656_v56 }
  0x90   : > { %4717 = vmatpush1.msk.msra.mxu0 %vm430_vm0, %v368_v53  ;;  %2362 = vmatprep.mubr.f32.mxu0 %v5224_v1 }
  0x91   : > { %4720 = vmatpush1.msk.msra.mxu1 %vm430_vm0, %v369_v54  ;;  %2433 = vmatprep.mubr.f32.mxu1 %v5224_v1 }
  0x92   : > { %4718 = vmatmul.mubr.msk.f32.vlgmr.msra.gmra.mrb[8].mxu0 %vm426_vm1, %v5555_v42  ;;  %4721 = vmatmul.mubr.msk.f32.vlgmr.msra.gmra.mrb[8].mxu1 %vm426_vm1, %v5555_v42 }
  0x93   : > { %4722 = vmatprep.subr.msk.mxu0 %vm430_vm0, %v1657_v59  ;;  %4725 = vmatprep.subr.msk.mxu1 %vm430_vm0, %v1658_v60 }
  0x94   : > { %4723 = vmatpush1.msk.msra.mxu0 %vm430_vm0, %v370_v57  ;;  %2504 = vmatprep.mubr.f32.mxu0 %v5224_v1 }
  0x95   : > { %4726 = vmatpush1.msk.msra.mxu1 %vm430_vm0, %v371_v58  ;;  %2575 = vmatprep.mubr.f32.mxu1 %v5224_v1 }
  0x96   : > { %4724 = vmatmul.mubr.msk.f32.vlgmr.msra.gmra.mrb[10].mxu0 %vm426_vm1, %v5555_v42  ;;  %4727 = vmatmul.mubr.msk.f32.vlgmr.msra.gmra.mrb[10].mxu1 %vm426_vm1, %v5555_v42 }
  0x97   : > { %4728 = vmatprep.subr.msk.mxu0 %vm430_vm0, %v1659_v63  ;;  %4731 = vmatprep.subr.msk.mxu1 %vm430_vm0, %v1660_v0 }
  0x98   : > { %4729 = vmatpush1.msk.msra.mxu0 %vm430_vm0, %v372_v61  ;;  %2646 = vmatprep.mubr.f32.mxu0 %v5224_v1 }
  0x99   : > { %4732 = vmatpush1.msk.msra.mxu1 %vm430_vm0, %v373_v62  ;;  %2717 = vmatprep.mubr.f32.mxu1 %v5224_v1 }
  0x9a   : > { %4730 = vmatmul.mubr.msk.f32.vlgmr.msra.gmra.mrb[12].mxu0 %vm426_vm1, %v5555_v42  ;;  %4733 = vmatmul.mubr.msk.f32.vlgmr.msra.gmra.mrb[12].mxu1 %vm426_vm1, %v5555_v42 }
  0x9b   : > { %4734 = vmatprep.subr.msk.mxu0 %vm430_vm0, %v1661_v4  ;;  %4737 = vmatprep.subr.msk.mxu1 %vm430_vm0, %v1662_v5 }
  0x9c   : > { %4735 = vmatpush1.msk.msra.mxu0 %vm430_vm0, %v374_v2  ;;  %2788 = vmatprep.mubr.f32.mxu0 %v5224_v1 }
  0x9d   : > { %4738 = vmatpush1.msk.msra.mxu1 %vm430_vm0, %v375_v3  ;;  %2859 = vmatprep.mubr.f32.mxu1 %v5224_v1 }
  0x9e   : > { %4736 = vmatmul.mubr.msk.f32.vlgmr.msra.gmra.mrb[14].mxu0 %vm426_vm1, %v5555_v42  ;;  %4739 = vmatmul.mubr.msk.f32.vlgmr.msra.gmra.mrb[14].mxu1 %vm426_vm1, %v5555_v42 }
  0x9f   : > { %2869 = vperm.xlu0 %4897, %v2866_v6   ;;  %3015 = vmatprep.mubr.f32.mxu0 %v5224_v1 }
  0xa0   : > { %3086 = vmatprep.mubr.f32.mxu1 %v5224_v1 }
  0xa3   : > { %2940 = vperm.xlu0 %4897, %v2937_v7  }
 0x11e   : > { %v5652_v8 = vpop.permute.xlu0 %2869 }
 0x155   : > { %v1796_v9 = vpop.f32.mrb[0].mxu0  ;;  %v1867_v10 = vpop.f32.mrb[0].mxu1 }
 0x156   : > { %v2872_v11 = vadd.f32 %v5652_v8, %v1796_v9  ;;  %v2874_v12 = vadd.f32 %v5652_v8, %v1867_v10  ;;  %v1798_v13 = vpop.f32.mrb[1].mxu0  ;;  %v1869_v14 = vpop.f32.mrb[1].mxu1 }
 0x157   : > { %v2873_v15 = vadd.f32 %v5652_v8, %v1798_v13  ;;  %v2875_v16 = vadd.f32 %v5652_v8, %v1869_v14 }
 0x158   : > { %v2904_v21 = vmax.f32 %v2872_v11, 0.0  ;;  %v2906_v22 = vmax.f32 %v2874_v12, 0.0 }
 0x159   : > { %v2905_v17 = vmax.f32 %v2873_v15, 0.0  ;;  %v2907_v18 = vmax.f32 %v2875_v16, 0.0  ;;  %v1938_v19 = vpop.f32.mrb[2].mxu0  ;;  %v2009_v20 = vpop.f32.mrb[2].mxu1 }
 0x15a   : > { %v2876_v23 = vadd.f32 %v5652_v8, %v1938_v19  ;;  %v2878_v24 = vadd.f32 %v5652_v8, %v2009_v20  ;;  %v1940_v25 = vpop.f32.mrb[3].mxu0  ;;  %v2011_v26 = vpop.f32.mrb[3].mxu1 }
 0x15b   : > { %v2877_v28 = vadd.f32 %v5652_v8, %v1940_v25  ;;  %v2879_v29 = vadd.f32 %v5652_v8, %v2011_v26  ;;  %2951 = vmatprep.subr.mxu0 %v2905_v17  ;;  %3022 = vmatprep.subr.mxu1 %v2907_v18 }
 0x15c   : > { %2952 = vmatpush1.msra.mxu0 %v2904_v21  ;;  %3023 = vmatpush1.msra.mxu1 %v2906_v22  ;;  %v2908_v34 = vmax.f32 %v2876_v23, 0.0  ;;  %v2910_v35 = vmax.f32 %v2878_v24, 0.0 }
 0x15d   : > { %v2909_v30 = vmax.f32 %v2877_v28, 0.0  ;;  %v2911_v31 = vmax.f32 %v2879_v29, 0.0  ;;  %v2080_v32 = vpop.f32.mrb[4].mxu0  ;;  %v2151_v33 = vpop.f32.mrb[4].mxu1  ;;  %4740 = vmatmul.mubr.msk.f32.vlgmr.msra.gmra.mrb[16].mxu0 %vm2947_vm2, %v5663_v27  ;;  %4741 = vmatmul.mubr.msk.f32.vlgmr.msra.gmra.mrb[16].mxu1 %vm2947_vm2, %v5663_v27 }
 0x15e   : > { %v2880_v36 = vadd.f32 %v5652_v8, %v2080_v32  ;;  %v2882_v37 = vadd.f32 %v5652_v8, %v2151_v33  ;;  %v2082_v38 = vpop.f32.mrb[5].mxu0  ;;  %v2153_v39 = vpop.f32.mrb[5].mxu1  ;;  %3157 = vmatprep.mubr.f32.mxu0 %v5224_v1  ;;  %3228 = vmatprep.mubr.f32.mxu1 %v5224_v1 }
 0x15f   : > { %v2881_v40 = vadd.f32 %v5652_v8, %v2082_v38  ;;  %v2883_v41 = vadd.f32 %v5652_v8, %v2153_v39  ;;  %3093 = vmatprep.subr.mxu0 %v2909_v30  ;;  %3164 = vmatprep.subr.mxu1 %v2911_v31 }
 0x160   : > { %3094 = vmatpush1.msra.mxu0 %v2908_v34  ;;  %3165 = vmatpush1.msra.mxu1 %v2910_v35  ;;  %v2912_v46 = vmax.f32 %v2880_v36, 0.0  ;;  %v2914_v47 = vmax.f32 %v2882_v37, 0.0 }
 0x161   : > { %v2913_v42 = vmax.f32 %v2881_v40, 0.0  ;;  %v2915_v43 = vmax.f32 %v2883_v41, 0.0  ;;  %v2222_v44 = vpop.f32.mrb[6].mxu0  ;;  %v2293_v45 = vpop.f32.mrb[6].mxu1  ;;  %4742 = vmatmul.mubr.msk.f32.vlgmr.msra.gmra.mrb[18].mxu0 %vm2947_vm2, %v5663_v27  ;;  %4743 = vmatmul.mubr.msk.f32.vlgmr.msra.gmra.mrb[18].mxu1 %vm2947_vm2, %v5663_v27 }
 0x162   : > { %v2884_v48 = vadd.f32 %v5652_v8, %v2222_v44  ;;  %v2886_v49 = vadd.f32 %v5652_v8, %v2293_v45  ;;  %v2224_v50 = vpop.f32.mrb[7].mxu0  ;;  %v2295_v51 = vpop.f32.mrb[7].mxu1  ;;  %3299 = vmatprep.mubr.f32.mxu0 %v5224_v1  ;;  %3370 = vmatprep.mubr.f32.mxu1 %v5224_v1 }
 0x163   : > { %v2885_v52 = vadd.f32 %v5652_v8, %v2224_v50  ;;  %v2887_v53 = vadd.f32 %v5652_v8, %v2295_v51  ;;  %3235 = vmatprep.subr.mxu0 %v2913_v42  ;;  %3306 = vmatprep.subr.mxu1 %v2915_v43 }
 0x164   : > { %3236 = vmatpush1.msra.mxu0 %v2912_v46  ;;  %3307 = vmatpush1.msra.mxu1 %v2914_v47  ;;  %v2916_v58 = vmax.f32 %v2884_v48, 0.0  ;;  %v2918_v59 = vmax.f32 %v2886_v49, 0.0  ;;  %v2941_v47 = vpop.permute.xlu0 %2940 }
 0x165   : > { %v2917_v54 = vmax.f32 %v2885_v52, 0.0  ;;  %v2919_v55 = vmax.f32 %v2887_v53, 0.0  ;;  %v2364_v56 = vpop.f32.mrb[8].mxu0  ;;  %v2435_v57 = vpop.f32.mrb[8].mxu1  ;;  %4744 = vmatmul.mubr.msk.f32.vlgmr.msra.gmra.mrb[20].mxu0 %vm2947_vm2, %v5663_v27  ;;  %4745 = vmatmul.mubr.msk.f32.vlgmr.msra.gmra.mrb[20].mxu1 %vm2947_vm2, %v5663_v27 }
 0x166   : > { %v2888_v60 = vadd.f32 %v5652_v8, %v2364_v56  ;;  %v2890_v61 = vadd.f32 %v5652_v8, %v2435_v57  ;;  %v2366_v62 = vpop.f32.mrb[9].mxu0  ;;  %v2437_v63 = vpop.f32.mrb[9].mxu1  ;;  %3441 = vmatprep.mubr.f32.mxu0 %v5224_v1  ;;  %3512 = vmatprep.mubr.f32.mxu1 %v5224_v1 }
 0x167   : > { %v2889_v0 = vadd.f32 %v5652_v8, %v2366_v62  ;;  %v2891_v2 = vadd.f32 %v5652_v8, %v2437_v63  ;;  %3377 = vmatprep.subr.mxu0 %v2917_v54  ;;  %3448 = vmatprep.subr.mxu1 %v2919_v55 }
 0x168   : > { %3378 = vmatpush1.msra.mxu0 %v2916_v58  ;;  %3449 = vmatpush1.msra.mxu1 %v2918_v59  ;;  %v2920_v7 = vmax.f32 %v2888_v60, 0.0  ;;  %v2922_v9 = vmax.f32 %v2890_v61, 0.0 }
 0x169   : > { %v2921_v3 = vmax.f32 %v2889_v0, 0.0  ;;  %v2923_v4 = vmax.f32 %v2891_v2, 0.0  ;;  %v2506_v5 = vpop.f32.mrb[10].mxu0  ;;  %v2577_v6 = vpop.f32.mrb[10].mxu1  ;;  %4746 = vmatmul.mubr.msk.f32.vlgmr.msra.gmra.mrb[22].mxu0 %vm2947_vm2, %v5663_v27  ;;  %4747 = vmatmul.mubr.msk.f32.vlgmr.msra.gmra.mrb[22].mxu1 %vm2947_vm2, %v5663_v27 }
 0x16a   : > { %v2892_v10 = vadd.f32 %v5652_v8, %v2506_v5  ;;  %v2894_v11 = vadd.f32 %v5652_v8, %v2577_v6  ;;  %v2508_v12 = vpop.f32.mrb[11].mxu0  ;;  %v2579_v13 = vpop.f32.mrb[11].mxu1  ;;  %3583 = vmatprep.mubr.f32.mxu0 %v5224_v1  ;;  %3654 = vmatprep.mubr.f32.mxu1 %v5224_v1 }
 0x16b   : > { %v2893_v14 = vadd.f32 %v5652_v8, %v2508_v12  ;;  %v2895_v15 = vadd.f32 %v5652_v8, %v2579_v13  ;;  %3519 = vmatprep.subr.mxu0 %v2921_v3  ;;  %3590 = vmatprep.subr.mxu1 %v2923_v4 }
 0x16c   : > { %3520 = vmatpush1.msra.mxu0 %v2920_v7  ;;  %3591 = vmatpush1.msra.mxu1 %v2922_v9  ;;  %v2924_v20 = vmax.f32 %v2892_v10, 0.0  ;;  %v2926_v21 = vmax.f32 %v2894_v11, 0.0 }
 0x16d   : > { %v2925_v16 = vmax.f32 %v2893_v14, 0.0  ;;  %v2927_v17 = vmax.f32 %v2895_v15, 0.0  ;;  %v2648_v18 = vpop.f32.mrb[12].mxu0  ;;  %v2719_v19 = vpop.f32.mrb[12].mxu1  ;;  %4748 = vmatmul.mubr.msk.f32.vlgmr.msra.gmra.mrb[24].mxu0 %vm2947_vm2, %v5663_v27  ;;  %4749 = vmatmul.mubr.msk.f32.vlgmr.msra.gmra.mrb[24].mxu1 %vm2947_vm2, %v5663_v27 }
 0x16e   : > { %v2896_v22 = vadd.f32 %v5652_v8, %v2648_v18  ;;  %v2898_v23 = vadd.f32 %v5652_v8, %v2719_v19  ;;  %v2650_v24 = vpop.f32.mrb[13].mxu0  ;;  %v2721_v25 = vpop.f32.mrb[13].mxu1  ;;  %3725 = vmatprep.mubr.f32.mxu0 %v5224_v1  ;;  %3796 = vmatprep.mubr.f32.mxu1 %v5224_v1 }
 0x16f   : > { %v2897_v26 = vadd.f32 %v5652_v8, %v2650_v24  ;;  %v2899_v28 = vadd.f32 %v5652_v8, %v2721_v25  ;;  %3661 = vmatprep.subr.mxu0 %v2925_v16  ;;  %3732 = vmatprep.subr.mxu1 %v2927_v17 }
 0x170   : > { %3662 = vmatpush1.msra.mxu0 %v2924_v20  ;;  %3733 = vmatpush1.msra.mxu1 %v2926_v21  ;;  %v2928_v33 = vmax.f32 %v2896_v22, 0.0  ;;  %v2930_v34 = vmax.f32 %v2898_v23, 0.0 }
 0x171   : > { %v2929_v29 = vmax.f32 %v2897_v26, 0.0  ;;  %v2931_v30 = vmax.f32 %v2899_v28, 0.0  ;;  %v2790_v31 = vpop.f32.mrb[14].mxu0  ;;  %v2861_v32 = vpop.f32.mrb[14].mxu1  ;;  %4750 = vmatmul.mubr.msk.f32.vlgmr.msra.gmra.mrb[26].mxu0 %vm2947_vm2, %v5663_v27  ;;  %4751 = vmatmul.mubr.msk.f32.vlgmr.msra.gmra.mrb[26].mxu1 %vm2947_vm2, %v5663_v27 }
 0x172   : > { %v2900_v35 = vadd.f32 %v5652_v8, %v2790_v31  ;;  %v2902_v36 = vadd.f32 %v5652_v8, %v2861_v32  ;;  %v2792_v37 = vpop.f32.mrb[15].mxu0  ;;  %v2863_v38 = vpop.f32.mrb[15].mxu1  ;;  %3867 = vmatprep.mubr.f32.mxu0 %v5224_v1  ;;  %3938 = vmatprep.mubr.f32.mxu1 %v5224_v1 }
 0x173   : > { %v2901_v39 = vadd.f32 %v5652_v8, %v2792_v37  ;;  %v2903_v40 = vadd.f32 %v5652_v8, %v2863_v38  ;;  %3803 = vmatprep.subr.mxu0 %v2929_v29  ;;  %3874 = vmatprep.subr.mxu1 %v2931_v30  ;;  %v2943_v8 = vlaneseq }
 0x174   : > { %3804 = vmatpush1.msra.mxu0 %v2928_v33  ;;  %3875 = vmatpush1.msra.mxu1 %v2930_v34  ;;  %v2932_v43 = vmax.f32 %v2900_v35, 0.0  ;;  %v2934_v44 = vmax.f32 %v2902_v36, 0.0 }
 0x175   : > { %v2933_v41 = vmax.f32 %v2901_v39, 0.0  ;;  %v2935_v42 = vmax.f32 %v2903_v40, 0.0  ;;  %4752 = vmatmul.mubr.msk.f32.vlgmr.msra.gmra.mrb[28].mxu0 %vm2947_vm2, %v5663_v27  ;;  %4753 = vmatmul.mubr.msk.f32.vlgmr.msra.gmra.mrb[28].mxu1 %vm2947_vm2, %v5663_v27  ;;  %v2944_v45 = vshrl.u32 %v2943_v8, 7 }
 0x176   : > { %4009 = vmatprep.mubr.f32.mxu0 %v5224_v1  ;;  %4080 = vmatprep.mubr.f32.mxu1 %v5224_v1 }
 0x177   : > { %3945 = vmatprep.subr.mxu0 %v2933_v41  ;;  %4016 = vmatprep.subr.mxu1 %v2935_v42  ;;  %v5737_v46 = vsub.s32 0, %v2944_v45 }
 0x178   : > { %3946 = vmatpush1.msra.mxu0 %v2932_v43  ;;  %4017 = vmatpush1.msra.mxu1 %v2934_v44 }
 0x179   : > { %4754 = vmatmul.mubr.msk.f32.vlgmr.msra.gmra.mrb[30].mxu0 %vm2947_vm2, %v5663_v27  ;;  %4755 = vmatmul.mubr.msk.f32.vlgmr.msra.gmra.mrb[30].mxu1 %vm2947_vm2, %v5663_v27  ;;  %v5740_v48 = vrot.slane %v2941_v47, %v5737_v46 }
 0x230   : > { %v3017_v49 = vpop.f32.mrb[16].mxu0  ;;  %v3088_v1 = vpop.f32.mrb[16].mxu1 }
 0x231   : > { %v3018_v50 = vadd.f32 %v3017_v49, %v5740_v48  ;;  %v3089_v51 = vadd.f32 %v3088_v1, %v5740_v48  ;;  %v3019_v52 = vpop.f32.mrb[17].mxu0  ;;  %v3090_v53 = vpop.f32.mrb[17].mxu1 }
 0x232   : > { %v3020_v54 = vadd.f32 %v3019_v52, %v5740_v48  ;;  %v3091_v27 = vadd.f32 %v3090_v53, %v5740_v48 }
 0x233   : > { %v4756_v55 = vmul.f32 -1.442695, %v3018_v50  ;;  %v4758_v56 = vmul.f32 -1.442695, %v3089_v51 }
 0x234   : > { %v4757_v57 = vmul.f32 -1.442695, %v3020_v54  ;;  %v4759_v58 = vmul.f32 -1.442695, %v3091_v27  ;;  %v3159_v59 = vpop.f32.mrb[18].mxu0  ;;  %v3230_v60 = vpop.f32.mrb[18].mxu1 }
 0x235   : > { %4930 = vpow2.f32 %v4756_v55  ;;  %v3160_v61 = vadd.f32 %v3159_v59, %v5740_v48  ;;  %v3231_v62 = vadd.f32 %v3230_v60, %v5740_v48  ;;  %v3161_v63 = vpop.f32.mrb[19].mxu0  ;;  %v3232_v0 = vpop.f32.mrb[19].mxu1 }
 0x236   : > { %4932 = vpow2.f32 %v4758_v56  ;;  %v3162_v2 = vadd.f32 %v3161_v63, %v5740_v48  ;;  %v3233_v3 = vadd.f32 %v3232_v0, %v5740_v48 }
 0x237   : > { %4934 = vpow2.f32 %v4757_v57  ;;  %v4760_v4 = vmul.f32 -1.442695, %v3160_v61  ;;  %v4762_v5 = vmul.f32 -1.442695, %v3231_v62 }
 0x238   : > { %4936 = vpow2.f32 %v4759_v58  ;;  %v4761_v6 = vmul.f32 -1.442695, %v3162_v2  ;;  %v4763_v7 = vmul.f32 -1.442695, %v3233_v3  ;;  %v3301_v9 = vpop.f32.mrb[20].mxu0  ;;  %v3372_v10 = vpop.f32.mrb[20].mxu1 }
 0x239   : > { %4938 = vpow2.f32 %v4760_v4  ;;  %v3302_v11 = vadd.f32 %v3301_v9, %v5740_v48  ;;  %v3373_v12 = vadd.f32 %v3372_v10, %v5740_v48  ;;  %v3303_v13 = vpop.f32.mrb[21].mxu0  ;;  %v3374_v14 = vpop.f32.mrb[21].mxu1 }
 0x23a   : > { %4940 = vpow2.f32 %v4762_v5  ;;  %v3304_v15 = vadd.f32 %v3303_v13, %v5740_v48  ;;  %v3375_v16 = vadd.f32 %v3374_v14, %v5740_v48 }
 0x23b   : > { %4942 = vpow2.f32 %v4761_v6  ;;  %v4764_v17 = vmul.f32 -1.442695, %v3302_v11  ;;  %v4766_v18 = vmul.f32 -1.442695, %v3373_v12 }
 0x23c   : > { %4944 = vpow2.f32 %v4763_v7  ;;  %v4765_v19 = vmul.f32 -1.442695, %v3304_v15  ;;  %v4767_v20 = vmul.f32 -1.442695, %v3375_v16  ;;  %v3443_v21 = vpop.f32.mrb[22].mxu0  ;;  %v3514_v22 = vpop.f32.mrb[22].mxu1 }
 0x23d   : > { %4946 = vpow2.f32 %v4764_v17  ;;  %v3444_v23 = vadd.f32 %v3443_v21, %v5740_v48  ;;  %v3445_v24 = vpop.f32.mrb[23].mxu0  ;;  %v3516_v25 = vpop.f32.mrb[23].mxu1  ;;  %v3515_v45 = vadd.f32 %v3514_v22, %v5740_v48 }
 0x23e   : > { %4948 = vpow2.f32 %v4766_v18  ;;  %v3446_v54 = vadd.f32 %v3445_v24, %v5740_v48  ;;  %v3517_v56 = vadd.f32 %v3516_v25, %v5740_v48 }
 0x23f   : > { %v4931_v26 = vpop.eup %4930  ;;  %4950 = vpow2.f32 %v4765_v19  ;;  %v4768_v28 = vmul.f32 -1.442695, %v3444_v23  ;;  %v4770_v60 = vmul.f32 -1.442695, %v3515_v45 }
 0x240   : > { %v4933_v29 = vpop.eup %4932  ;;  %v4183_v30 = vadd.f32 1.0, %v4931_v26  ;;  %4952 = vpow2.f32 %v4767_v20  ;;  %v3585_v31 = vpop.f32.mrb[24].mxu0  ;;  %v4769_v9 = vmul.f32 -1.442695, %v3446_v54  ;;  %v4771_v13 = vmul.f32 -1.442695, %v3517_v56 }
 0x241   : > { %v4935_v32 = vpop.eup %4934  ;;  %v4185_v33 = vadd.f32 1.0, %v4933_v29  ;;  %4954 = vpow2.f32 %v4768_v28  ;;  %v3656_v34 = vpop.f32.mrb[24].mxu1  ;;  %v3586_v61 = vadd.f32 %v3585_v31, %v5740_v48 }
 0x242   : > { %v3587_v35 = vpop.f32.mrb[25].mxu0  ;;  %v4937_v36 = vpop.eup %4936  ;;  %4956 = vrcp.f32 %v4183_v30  ;;  %v4184_v37 = vadd.f32 1.0, %v4935_v32  ;;  %v3657_v3 = vadd.f32 %v3656_v34, %v5740_v48 }
 0x243   : > { %v3658_v38 = vpop.f32.mrb[25].mxu1  ;;  %v4939_v39 = vpop.eup %4938  ;;  %4958 = vrcp.f32 %v4185_v33  ;;  %v4186_v40 = vadd.f32 1.0, %v4937_v36  ;;  %v3588_v4 = vadd.f32 %v3587_v35, %v5740_v48  ;;  %v4772_v18 = vmul.f32 -1.442695, %v3586_v61 }
 0x244   : > { %v4941_v41 = vpop.eup %4940  ;;  %4960 = vrcp.f32 %v4184_v37  ;;  %v4187_v42 = vadd.f32 1.0, %v4939_v39  ;;  %v3727_v43 = vpop.f32.mrb[26].mxu0  ;;  %v3659_v10 = vadd.f32 %v3658_v38, %v5740_v48  ;;  %v4774_v24 = vmul.f32 -1.442695, %v3657_v3 }
 0x245   : > { %v4943_v44 = vpop.eup %4942  ;;  %4962 = vrcp.f32 %v4186_v40  ;;  %v4189_v8 = vadd.f32 1.0, %v4941_v41  ;;  %v3798_v47 = vpop.f32.mrb[26].mxu1  ;;  %v3728_v14 = vadd.f32 %v3727_v43, %v5740_v48  ;;  %v4773_v25 = vmul.f32 -1.442695, %v3588_v4 }
 0x246   : > { %v3729_v49 = vpop.f32.mrb[27].mxu0  ;;  %v4945_v1 = vpop.eup %4944  ;;  %4964 = vrcp.f32 %v4187_v42  ;;  %v4188_v50 = vadd.f32 1.0, %v4943_v44  ;;  %v3799_v19 = vadd.f32 %v3798_v47, %v5740_v48  ;;  %v4775_v30 = vmul.f32 -1.442695, %v3659_v10 }
 0x247   : > { %v3800_v51 = vpop.f32.mrb[27].mxu1  ;;  %v4947_v52 = vpop.eup %4946  ;;  %4966 = vrcp.f32 %v4189_v8  ;;  %v4190_v53 = vadd.f32 1.0, %v4945_v1  ;;  %v3730_v31 = vadd.f32 %v3729_v49, %v5740_v48  ;;  %v4776_v34 = vmul.f32 -1.442695, %v3728_v14  ;;  %v5058_v8 = vld [vmem:[%s5439_s11] sm:$0xff] }
 0x248   : > { %v4949_v27 = vpop.eup %4948  ;;  %4968 = vrcp.f32 %v4188_v50  ;;  %v4191_v55 = vadd.f32 1.0, %v4947_v52  ;;  %v3869_v57 = vpop.f32.mrb[28].mxu0  ;;  %v3801_v35 = vadd.f32 %v3800_v51, %v5740_v48  ;;  %v4778_v39 = vmul.f32 -1.442695, %v3799_v19  ;;  %v5059_v50 = vld [vmem:[%s5439_s11 + $0x8] sm:$0xff] }
 0x249   : > { %v4951_v58 = vpop.eup %4950  ;;  %4970 = vrcp.f32 %v4190_v53  ;;  %v4193_v59 = vadd.f32 1.0, %v4949_v27  ;;  %v3940_v62 = vpop.f32.mrb[28].mxu1  ;;  %v3870_v43 = vadd.f32 %v3869_v57, %v5740_v48  ;;  %v4777_v53 = vmul.f32 -1.442695, %v3730_v31 }
 0x24a   : > { %v5759_v63 = vpop.f32.mrb[29].mxu0  ;;  %v4953_v0 = vpop.eup %4952  ;;  %4972 = vrcp.f32 %v4191_v55  ;;  %v4192_v2 = vadd.f32 1.0, %v4951_v58  ;;  %v3941_v49 = vadd.f32 %v3940_v62, %v5740_v48  ;;  %v4779_v56 = vmul.f32 -1.442695, %v3801_v35  ;;  %v5060_v62 = vld [vmem:[%s5439_s11 + $0x10] sm:$0xff] }
 0x24b   : > { %v5763_v5 = vpop.f32.mrb[29].mxu1  ;;  %v4955_v6 = vpop.eup %4954  ;;  %4974 = vrcp.f32 %v4193_v59  ;;  %v4194_v7 = vadd.f32 1.0, %v4953_v0 }
 0x24c   : > { %v4957_v11 = vpop.eup %4956  ;;  %4976 = vrcp.f32 %v4192_v2  ;;  %v4195_v12 = vadd.f32 1.0, %v4955_v6  ;;  %v5767_v15 = vpop.f32.mrb[30].mxu0  ;;  %v4782_v3 = vmul.f32 -1.442695, %v3941_v49  ;;  %v5061_v6 = vld [vmem:[%s5439_s11 + $0x18] sm:$0xff] }
 0x24d   : > { %v4959_v16 = vpop.eup %4958  ;;  %v4282_v17 = vrot.slane %v4957_v11, %v5737_v46  ;;  %4978 = vrcp.f32 %v4194_v7  ;;  %v5771_v20 = vpop.f32.mrb[30].mxu1 }
 0x24e   : > { %v5773_v21 = vpop.f32.mrb[31].mxu0  ;;  %v4961_v22 = vpop.eup %4960  ;;  %v4290_v23 = vrot.slane %v4959_v16, %v5737_v46  ;;  %4980 = vrcp.f32 %v4195_v12 }
 0x24f   : > { %v5776_v26 = vpop.f32.mrb[31].mxu1  ;;  %v4963_v28 = vpop.eup %4962  ;;  %v4286_v29 = vrot.slane %v4961_v22, %v5737_v46  ;;  %4982 = vpow2.f32 %v4770_v60  ;;  %v4780_v60 = vmul.f32 -1.442695, %v3870_v43 }
 0x250   : > { %v4965_v32 = vpop.eup %4964  ;;  %v4294_v33 = vrot.slane %v4963_v28, %v5737_v46  ;;  %4984 = vpow2.f32 %v4769_v9 }
 0x251   : > { %v4967_v36 = vpop.eup %4966  ;;  %v4439_v37 = vcombine.low %v4282_v17, %v4286_v29  ;;  %v4298_v38 = vrot.slane %v4965_v32, %v5737_v46  ;;  %4986 = vpow2.f32 %v4771_v13  ;;  %v5062_v17 = vld [vmem:[%s5439_s11 + $0x20] sm:$0xff] }
 0x252   : > { %v4969_v40 = vpop.eup %4968  ;;  %v4440_v41 = vcombine.low %v4290_v23, %v4294_v33  ;;  %v4306_v42 = vrot.slane %v4967_v36, %v5737_v46  ;;  %4988 = vpow2.f32 %v4772_v18  ;;  %v5063_v23 = vld [vmem:[%s5439_s11 + $0x28] sm:$0xff] }
 0x253   : > { %v4971_v44 = vpop.eup %4970  ;;  %v4471_v45 = vmul.f32 %v5058_v8, %v4439_v37  ;;  %v4302_v47 = vrot.slane %v4969_v40, %v5737_v46  ;;  %4990 = vpow2.f32 %v4774_v24 }
 0x254   : > { %v4973_v1 = vpop.eup %4972  ;;  %v4472_v51 = vmul.f32 %v5059_v50, %v4440_v41  ;;  %v4310_v52 = vrot.slane %v4971_v44, %v5737_v46  ;;  %4992 = vpow2.f32 %v4773_v25  ;;  %v3943_v41 = vadd.f32 %v5763_v5, %v5740_v48 }
 0x255   : > { %v4975_v54 = vpop.eup %4974  ;;  %4487 = vst [vmem:[%s5791_s21] sm:$0xff] %v4471_v45  ;;  %v4441_v27 = vcombine.low %v4298_v38, %v4302_v47  ;;  %v4314_v55 = vrot.slane %v4973_v1, %v5737_v46  ;;  %4994 = vpow2.f32 %v4775_v30  ;;  %v3872_v38 = vadd.f32 %v5759_v63, %v5740_v48 }
 0x256   : > { %v4977_v57 = vpop.eup %4976  ;;  %4488 = vst [vmem:[%s5791_s21 + $0x8] sm:$0xff] %v4472_v51  ;;  %v4442_v58 = vcombine.low %v4306_v42, %v4310_v52  ;;  %v4322_v59 = vrot.slane %v4975_v54, %v5737_v46  ;;  %4996 = vpow2.f32 %v4776_v34  ;;  %v4012_v44 = vadd.f32 %v5767_v15, %v5740_v48 }
 0x257   : > { %v4979_v61 = vpop.eup %4978  ;;  %v4473_v0 = vmul.f32 %v5060_v62, %v4441_v27  ;;  %v4318_v2 = vrot.slane %v4977_v57, %v5737_v46  ;;  %4998 = vpow2.f32 %v4778_v39  ;;  %v4083_v47 = vadd.f32 %v5771_v20, %v5740_v48 }
 0x258   : > { %v5799_v4 = vpop.eup %4980  ;;  %v4474_v7 = vmul.f32 %v5061_v6, %v4442_v58  ;;  %v4326_v9 = vrot.slane %v4979_v61, %v5737_v46  ;;  %5000 = vpow2.f32 %v4777_v53  ;;  %v4781_v63 = vmul.f32 -1.442695, %v3872_v38 }
 0x259   : > { %v4983_v10 = vpop.eup %4982  ;;  %4489 = vst [vmem:[%s5791_s21 + $0x10] sm:$0xff] %v4473_v0  ;;  %v4443_v11 = vcombine.low %v4314_v55, %v4318_v2  ;;  %5002 = vpow2.f32 %v4779_v56  ;;  %v4014_v1 = vadd.f32 %v5773_v21, %v5740_v48  ;;  %v4330_v5 = vrot.slane %v5799_v4, %v5737_v46  ;;  %v5064_v2 = vld [vmem:[%s5439_s11 + $0x30] sm:$0xff] }
 0x25a   : > { %v4985_v12 = vpop.eup %4984  ;;  %4490 = vst [vmem:[%s5791_s21 + $0x18] sm:$0xff] %v4474_v7  ;;  %v4444_v13 = vcombine.low %v4322_v59, %v4326_v9  ;;  %v4197_v14 = vadd.f32 1.0, %v4983_v10  ;;  %5004 = vpow2.f32 %v4780_v60  ;;  %v4783_v51 = vmul.f32 -1.442695, %v3943_v41  ;;  %v5065_v7 = vld [vmem:[%s5439_s11 + $0x38] sm:$0xff] }
 0x25b   : > { %v4987_v16 = vpop.eup %4986  ;;  %v4475_v18 = vmul.f32 %v5062_v17, %v4443_v11  ;;  %v4196_v19 = vadd.f32 1.0, %v4985_v12  ;;  %5006 = vpow2.f32 %v4782_v3  ;;  %v4085_v15 = vadd.f32 %v5776_v26, %v5740_v48 }
 0x25c   : > { %v4989_v22 = vpop.eup %4988  ;;  %v4476_v24 = vmul.f32 %v5063_v23, %v4444_v13  ;;  %5008 = vrcp.f32 %v4197_v14  ;;  %v4198_v25 = vadd.f32 1.0, %v4987_v16  ;;  %v4784_v54 = vmul.f32 -1.442695, %v4012_v44  ;;  %v5066_v23 = vld [vmem:[%s5439_s11 + $0x40] sm:$0xff] }
 0x25d   : > { %v4991_v28 = vpop.eup %4990  ;;  %4491 = vst [vmem:[%s5791_s21 + $0x20] sm:$0xff] %v4475_v18  ;;  %5010 = vrcp.f32 %v4196_v19  ;;  %v4199_v29 = vadd.f32 1.0, %v4989_v22  ;;  %v4786_v55 = vmul.f32 -1.442695, %v4083_v47  ;;  %v4785_v57 = vmul.f32 -1.442695, %v4014_v1 }
 0x25e   : > { %v4993_v30 = vpop.eup %4992  ;;  %4492 = vst [vmem:[%s5791_s21 + $0x28] sm:$0xff] %v4476_v24  ;;  %5012 = vrcp.f32 %v4198_v25  ;;  %v4201_v31 = vadd.f32 1.0, %v4991_v28  ;;  %v4787_v48 = vmul.f32 -1.442695, %v4085_v15  ;;  %v5067_v28 = vld [vmem:[%s5439_s11 + $0x48] sm:$0xff] }
 0x25f   : > { %v4995_v32 = vpop.eup %4994  ;;  %5014 = vrcp.f32 %v4199_v29  ;;  %v4200_v33 = vadd.f32 1.0, %v4993_v30 }
 0x260   : > { %v4997_v34 = vpop.eup %4996  ;;  %5016 = vrcp.f32 %v4201_v31  ;;  %v4202_v35 = vadd.f32 1.0, %v4995_v32 }
 0x261   : > { %v4999_v36 = vpop.eup %4998  ;;  %5018 = vrcp.f32 %v4200_v33  ;;  %v4203_v37 = vadd.f32 1.0, %v4997_v34 }
 0x262   : > { %v5001_v39 = vpop.eup %5000  ;;  %5020 = vrcp.f32 %v4202_v35  ;;  %v4205_v40 = vadd.f32 1.0, %v4999_v36  ;;  %v5068_v35 = vld [vmem:[%s5439_s11 + $0x50] sm:$0xff] }
 0x263   : > { %v5003_v42 = vpop.eup %5002  ;;  %5022 = vrcp.f32 %v4203_v37  ;;  %v4204_v43 = vadd.f32 1.0, %v5001_v39  ;;  %v5069_v39 = vld [vmem:[%s5439_s11 + $0x58] sm:$0xff] }
 0x264   : > { %v5005_v8 = vpop.eup %5004  ;;  %5024 = vrcp.f32 %v4205_v40  ;;  %v4206_v45 = vadd.f32 1.0, %v5003_v42 }
 0x265   : > { %v5007_v49 = vpop.eup %5006  ;;  %5026 = vrcp.f32 %v4204_v43  ;;  %v4207_v14 = vadd.f32 1.0, %v5005_v8 }
 0x266   : > { %v5009_v50 = vpop.eup %5008  ;;  %5028 = vrcp.f32 %v4206_v45  ;;  %v4209_v19 = vadd.f32 1.0, %v5007_v49 }
 0x267   : > { %v5011_v52 = vpop.eup %5010  ;;  %v4338_v53 = vrot.slane %v5009_v50, %v5737_v46  ;;  %5030 = vpow2.f32 %v4781_v63 }
 0x268   : > { %v5013_v20 = vpop.eup %5012  ;;  %v4334_v27 = vrot.slane %v5011_v52, %v5737_v46  ;;  %5032 = vpow2.f32 %v4783_v51 }
 0x269   : > { %v5015_v56 = vpop.eup %5014  ;;  %v4342_v21 = vrot.slane %v5013_v20, %v5737_v46  ;;  %5034 = vpow2.f32 %v4784_v54 }
 0x26a   : > { %v5017_v58 = vpop.eup %5016  ;;  %v4445_v59 = vcombine.low %v4330_v5, %v4334_v27  ;;  %v4346_v60 = vrot.slane %v5015_v56, %v5737_v46  ;;  %5036 = vpow2.f32 %v4786_v55 }
 0x26b   : > { %v5019_v26 = vpop.eup %5018  ;;  %v4446_v61 = vcombine.low %v4338_v53, %v4342_v21  ;;  %v4354_v62 = vrot.slane %v5017_v58, %v5737_v46  ;;  %5038 = vpow2.f32 %v4785_v57 }
 0x26c   : > { %v5021_v0 = vpop.eup %5020  ;;  %v4477_v3 = vmul.f32 %v5064_v2, %v4445_v59  ;;  %v4350_v4 = vrot.slane %v5019_v26, %v5737_v46  ;;  %5040 = vpow2.f32 %v4787_v48  ;;  %v5070_v59 = vld [vmem:[%s5439_s11 + $0x60] sm:$0xff]  ;;  %v5071_v26 = vld [vmem:[%s5439_s11 + $0x68] sm:$0xff] }
 0x26d   : > { %v5023_v6 = vpop.eup %5022  ;;  %v4478_v9 = vmul.f32 %v5065_v7, %v4446_v61  ;;  %v4358_v10 = vrot.slane %v5021_v0, %v5737_v46  ;;  %5042 = vrcp.f32 %v4207_v14 }
 0x26e   : > { %v5025_v11 = vpop.eup %5024  ;;  %4493 = vst [vmem:[%s5791_s21 + $0x30] sm:$0xff] %v4477_v3  ;;  %v4447_v12 = vcombine.low %v4346_v60, %v4350_v4  ;;  %v4362_v13 = vrot.slane %v5023_v6, %v5737_v46  ;;  %5044 = vrcp.f32 %v4209_v19  ;;  %v5072_v3 = vld [vmem:[%s5439_s11 + $0x70] sm:$0xff]  ;;  %v5073_v6 = vld [vmem:[%s5439_s11 + $0x78] sm:$0xff]  ;;  %s5226_s11 = smov [#allocation8]  }
 0x26f   : > { %v5027_v16 = vpop.eup %5026  ;;  %4494 = vst [vmem:[%s5791_s21 + $0x38] sm:$0xff] %v4478_v9  ;;  %v4448_v17 = vcombine.low %v4354_v62, %v4358_v10  ;;  %v4370_v18 = vrot.slane %v5025_v11, %v5737_v46  ;;  %s5138_s22 = sshll.u32 %s5226_s11, 4  ;;  %s5139_s22 = int_to_ptr.vmem [resolvable:$false] %s5138_s22 }
 0x270   : > { %v5029_v22 = vpop.eup %5028  ;;  %v4479_v24 = vmul.f32 %v5066_v23, %v4447_v12  ;;  %v4366_v25 = vrot.slane %v5027_v16, %v5737_v46  ;;  %s5140_s23 = scalar_lea.vmem %s5139_s22, 4096  ;;  %p5141_p10 = scmp.lt.s32.totalorder %s5867_s20, %s5139_s22 }
 0x271   : > { %v4480_v29 = vmul.f32 %v5067_v28, %v4448_v17  ;;  %v4374_v30 = vrot.slane %v5029_v22, %v5737_v46  ;;  %v5031_v32 = vpop.eup %5030  ;;  %p5142_p12 = scmp.lt.s32.totalorder %s5140_s23, %s5134_s24 }
 0x272   : > { %4495 = vst [vmem:[%s5791_s21 + $0x40] sm:$0xff] %v4479_v24  ;;  %v4449_v31 = vcombine.low %v4362_v13, %v4366_v25  ;;  %v5033_v34 = vpop.eup %5032  ;;  %v4208_v37 = vadd.f32 1.0, %v5031_v32 }
 0x273   : > { %4496 = vst [vmem:[%s5791_s21 + $0x48] sm:$0xff] %v4480_v29  ;;  %v4450_v33 = vcombine.low %v4370_v18, %v4374_v30  ;;  %v5035_v38 = vpop.eup %5034  ;;  %v4210_v41 = vadd.f32 1.0, %v5033_v34  ;;  %p5143_p1 = por %p5142_p12, %p5141_p10 }
 0x274   : > { %v4481_v36 = vmul.f32 %v5068_v35, %v4449_v31  ;;  %v5037_v42 = vpop.eup %5036  ;;  %5046 = vrcp.f32 %v4208_v37  ;;  %v4211_v43 = vadd.f32 1.0, %v5035_v38 }
 0x275   : > { %v4482_v40 = vmul.f32 %v5069_v39, %v4450_v33  ;;  %v5039_v44 = vpop.eup %5038  ;;  %5048 = vrcp.f32 %v4210_v41  ;;  %v4213_v8 = vadd.f32 1.0, %v5037_v42  ;;  %p5144_p2 = pnand %p5143_p1, %p5137_p4 }
 0x276   : > { %4497 = vst [vmem:[%s5791_s21 + $0x50] sm:$0xff] %v4481_v36  ;;  %v5041_v45 = vpop.eup %5040  ;;  %5050 = vrcp.f32 %v4211_v43  ;;  %v4212_v47 = vadd.f32 1.0, %v5039_v44 }
 0x277   : > { %4498 = vst [vmem:[%s5791_s21 + $0x58] sm:$0xff] %v4482_v40  ;;  %5052 = vrcp.f32 %v4213_v8  ;;  %v4214_v49 = vadd.f32 1.0, %v5041_v45  ;;  %v5043_v63 = vpop.eup %5042 }
 0x278   : > { %5054 = vrcp.f32 %v4212_v47  ;;  %v5045_v1 = vpop.eup %5044  ;;  %v4378_v50 = vrot.slane %v5043_v63, %v5737_v46 }
 0x279   : > { %5056 = vrcp.f32 %v4214_v49  ;;  %v4386_v51 = vrot.slane %v5045_v1, %v5737_v46 }
 0x27e   : > { %v5047_v5 = vpop.eup %5046 }
 0x27f   : > { %v5049_v15 = vpop.eup %5048  ;;  %v4382_v52 = vrot.slane %v5047_v5, %v5737_v46 }
 0x280   : > { %v5051_v53 = vpop.eup %5050  ;;  %v4390_v54 = vrot.slane %v5049_v15, %v5737_v46 }
 0x281   : > { %v5053_v20 = vpop.eup %5052  ;;  %v4451_v27 = vcombine.low %v4378_v50, %v4382_v52  ;;  %v4394_v55 = vrot.slane %v5051_v53, %v5737_v46 }
 0x282   : > { %v5055_v56 = vpop.eup %5054  ;;  %v4452_v21 = vcombine.low %v4386_v51, %v4390_v54  ;;  %v4402_v57 = vrot.slane %v5053_v20, %v5737_v46 }
 0x283   : > { %v5057_v58 = vpop.eup %5056  ;;  %v4483_v60 = vmul.f32 %v5070_v59, %v4451_v27  ;;  %v4398_v48 = vrot.slane %v5055_v56, %v5737_v46 }
 0x284   : > { %v4484_v61 = vmul.f32 %v5071_v26, %v4452_v21  ;;  %v4406_v62 = vrot.slane %v5057_v58, %v5737_v46 }
 0x285   : > { %4499 = vst [vmem:[%s5791_s21 + $0x60] sm:$0xff] %v4483_v60  ;;  %v4453_v0 = vcombine.low %v4394_v55, %v4398_v48 }
 0x286   : > { %4500 = vst [vmem:[%s5791_s21 + $0x68] sm:$0xff] %v4484_v61  ;;  %v4454_v2 = vcombine.low %v4402_v57, %v4406_v62 }
 0x287   : > { %v4485_v4 = vmul.f32 %v5072_v3, %v4453_v0 }
 0x288   : > { %v4486_v7 = vmul.f32 %v5073_v6, %v4454_v2 }
 0x289   : > { %4501 = vst [vmem:[%s5791_s21 + $0x70] sm:$0xff] %v4485_v4 }
 0x28a   : > { %4502 = vst [vmem:[%s5791_s21 + $0x78] sm:$0xff] %v4486_v7 }
 0x28b   : > { %5147 = shalt.err (!%p5144_p2)
}
 0x28c   : > { %s5148_s25 = scalar_lea.hbm %s5865_s14, 2048  ;;  %s5152_s13 = scalar_lea.hbm %s5923_s7, 4096 }
 0x28d   : > { %p5149_p9 = scmp.ne.s32.totalorder %s5865_s14, %s5148_s25  ;;  %p5153_p6 = scmp.lt.u32.totalorder %s5865_s14, %s5923_s7 }
 0x28e   : > { %p5154_p13 = scmp.lt.u32.totalorder %s5152_s13, %s5148_s25  ;;  %p5156_p0 = scmp.lt.u32.totalorder %s5148_s25, %s5865_s14 }
 0x28f   : > { %p5150_p11 = pnand %p5149_p9, %p5940_p5 }
 0x290   : > { %p5155_p8 = por %p5154_p13, %p5153_p6 }
 0x291   : > { %p5151_p3 = pneg %p5150_p11 }
 0x292   : > { %p5157_p7 = por %p5156_p0, %p5155_p8 }
 0x294   : > { %p5158_p4 = pnand %p5157_p7, %p5151_p3 }
 0x296   : > { %5161 = shalt.err (!%p5158_p4)
}
 0x297   : > { %4832 = dma.vmem_to_hbm [thread:$0]  (%p5940_p5), %s5867_s20, 2048, %s5865_s14, %s4504_s29  }
 0x298 PF: > { %s4532_s9 = sand.u32 1, %s5200_s26   ;;  %p5941_p10 = scmp.ne.s32.totalorder %s5931_s17, 0 }
 0x299   : > { %p5942_p12 = scmp.ge.s32.totalorder %s5220_s8, 2  ;;  %s4533_s19 = scalar_lea.sflag [#allocation5], %s4532_s9 }
 0x29b   : > { %p4842_p1 = pnand %p5942_p12, %p5941_p10 }
 0x29d   : > { %5195 = dma.done.wait (!%p4842_p1), %s4533_s19, 2048  }
 0x29e   : > { %5197 = vsyncadd (!%p4842_p1), %s4533_s19, 4294965248  ;;  %s28_s8 = sadd.s32 1, %s5220_s8   ;;  %s5943_s26 = smov %s5204_s27 }
 0x29f   : > { %p25_p2 = scmp.ge.s32.totalorder %s28_s8, 4   ;;  %s5944_s27 = smov %s5208_s28 }
 0x2a0   : > { %s5945_s28 = smov %s5326_s16  ;;  %s5946_s29 = smov %s5216_s30 }
 0x2a1   : > { %s5947_s30 = smov %s5949_s10  ;;  %27 = sbr.rel (!%p25_p2) target bundleno = 11 (0xb), region = 106 }
 0x2a8   :  { %4538 = vsyncpa [#allocation4], 1 }
 0x2a9   :  { %4540 = vsyncpa [#allocation4 + $0x1], 1 }
 0x2aa   :  { %4541 = vsyncpa [#allocation7], 1 }
 0x2ab   :  { %4543 = vsyncpa [#allocation7 + $0x1], 1 }
 0x2ac   :  { %4544 = vsyncpa [#allocation5], 1 }
 0x2ad   :  { %4546 = vsyncpa [#allocation5 + $0x1], 1 }

</bundles_post_ra>
